<compile_context>
chip_gen: v5e
topology: v5e:2x2
jax: 0.10.0
libtpu: 0.0.40
codegen_flags: <defaults>
</compile_context>

<pallas_src>
import functools

import jax
import jax.numpy as jnp
from jax.experimental import pallas as pl
from jax.experimental.pallas import tpu as pltpu

LANE = 128          # lane width: feature dims are padded to this
SUBLANE = 8         # f32 sublane granularity
INT8_SUBLANE = 32   # int8 packs 32 rows per sublane group
NUM_LAYERS = 3


def _round_up(v, m):
    return (v + m - 1) // m * m


# ----------------------------------------------------------------------------
# Fused Pallas kernel: 3x GCNConv (+relu) -> mean-pool -> Linear
# ----------------------------------------------------------------------------
def _fused_gcn_kernel(adj_ref, x_ref, dscale_ref, w_ref, b_ref, pool_ref,
                      wlin_ref, blin_ref, out_ref, h_ref, hw_ref, pooled_ref,
                      *, tm, num_layers, adj_resident):
    l = pl.program_id(0)            # layer index (outer, sequential)
    i = pl.program_id(1)            # adjacency row-tile index (inner)
    last_layer = num_layers - 1
    last_tile = pl.num_programs(1) - 1

    # First grid step: stage padded features into ping-pong slot 0 and zero the
    # pooled accumulator. (Pad-node rows carry relu(bias) values through the layers;
    # harmless wasted work because their adjacency / pool columns are all zero.)
    @pl.when((l == 0) & (i == 0))
    def _():
        h_ref[0] = x_ref[...]
        pooled_ref[...] = jnp.zeros_like(pooled_ref)

    # Hoisted per-layer weight matmul:  (A_hat H) W == A_hat (H W).  Compute
    #   HW_s = D^-1/2 * (H_l @ W_l)
    # once per layer so every row tile only performs a single adjacency matmul.
    @pl.when(i == 0)
    def _():
        hw = jnp.dot(h_ref[l % 2], w_ref[0], preferred_element_type=jnp.float32)
        hw_ref[...] = (hw * dscale_ref[...]).astype(jnp.bfloat16)

    row0 = pl.multiple_of(i * tm, tm)
    if adj_resident:                               # static (trace-time) branch
        adj_tile = adj_ref[pl.ds(row0, tm), :]     # slice the VMEM-resident (A+I)
    else:
        adj_tile = adj_ref[...]                    # streamed (tm, N) row tile

    # (A + I) entries are exact small ints -> the upcast is exact; f32 MXU accumulate.
    adj_bf16 = adj_tile.astype(jnp.float32).astype(jnp.bfloat16)
    agg = jnp.dot(adj_bf16, hw_ref[...], preferred_element_type=jnp.float32)
    out = dscale_ref[pl.ds(row0, tm), :] * agg + b_ref[0]        # (tm, 128) f32

    # Hidden layers: ReLU + write to the other ping-pong slot.
    @pl.when(l < last_layer)
    def _():
        h_ref[(l + 1) % 2, pl.ds(row0, tm), :] = (
            jnp.maximum(out, 0.0).astype(jnp.bfloat16))

    # Last layer: fold global_mean_pool into the per-tile loop (small f32 matmul)
    # instead of one big serialized matmul in the epilogue.
    @pl.when(l == last_layer)
    def _():
        pooled_ref[...] += jnp.dot(pool_ref[...], out,
                                   preferred_element_type=jnp.float32)

    # Epilogue: final Linear on the pooled per-graph features.
    # TODO(synk): F.dropout(p=0.5, training=self.training) is identity at inference;
    # training parity would need pltpu.prng_seed/prng_random_bits + 1/(1-p) scaling.
    @pl.when((l == last_layer) & (i == last_tile))
    def _():
        out_ref[...] = (jnp.dot(pooled_ref[...], wlin_ref[...],
                                preferred_element_type=jnp.float32) + blin_ref[...])


# ----------------------------------------------------------------------------
# Glue (plain JAX): (A+I) + degree scale from edge_index, pooling matrix from batch
# ----------------------------------------------------------------------------
def _self_loop_adjacency(edge_index, num_nodes):
    """(A + I) with integer edge multiplicities, and D^-1/2 of its row degrees."""
    src, dst = edge_index[0], edge_index[1]
    a = jnp.zeros((num_nodes, num_nodes), jnp.float32).at[dst, src].add(1.0)
    a = a + jnp.eye(num_nodes, dtype=jnp.float32)
    deg = a.sum(axis=1)
    d_inv_sqrt = jnp.where(deg > 0, 1.0 / jnp.sqrt(deg), 0.0)
    return a, d_inv_sqrt


def _mean_pool_matrix(batch, num_graphs):
    onehot = (batch[None, :] == jnp.arange(num_graphs)[:, None]).astype(jnp.float32)
    counts = jnp.maximum(onehot.sum(axis=1, keepdims=True), 1.0)
    return onehot / counts                      # [G, N]


# ----------------------------------------------------------------------------
# Full forward pass (single fused pallas_call)
# ----------------------------------------------------------------------------
def gcn_forward(params, x, edge_index, batch, num_graphs, *, row_tile=256):
    n, f_in = x.shape
    hidden = params["w1"].shape[1]
    n_classes = params["w_lin"].shape[1]
    assert f_in <= LANE and hidden <= LANE and n_classes <= LANE
    num_layers = NUM_LAYERS

    # --- tiling: small graphs collapse the row axis entirely (grid = (3, 1));
    #     larger graphs use row_tile rows (kept a multiple of 32 for int8 packing) ---
    if n <= 512:
        tm = _round_up(n, INT8_SUBLANE)
        n_pad = tm
    else:
        tm = _round_up(row_tile, INT8_SUBLANE)
        n_pad = _round_up(n, tm)
    n_row_tiles = n_pad // tm
    g_pad = _round_up(max(num_graphs, 1), SUBLANE)

    # --- generation-aware VMEM budget & adjacency residency decision ---
    try:
        vmem_cap = int(pltpu.get_tpu_info().vmem_capacity_bytes)
    except Exception:
        vmem_cap = 64 * 1024 * 1024            # conservative (v7x-sized) fallback
    fixed_vmem = (
        2 * n_pad * LANE * 2                   # activation ping-pong scratch (bf16)
        + n_pad * LANE * 2                     # hoisted H@W scratch (bf16)
        + 2 * n_pad * LANE * 4                 # D^-1/2 rows (f32, double-buffered)
        + 2 * n_pad * LANE * 2                 # features (bf16, double-buffered)
        + 2 * g_pad * tm * 4                   # pool tiles (f32, double-buffered)
        + 2 * (LANE * LANE * 2 + LANE * 4)     # per-layer W / b (double-buffered)
        + 2 * (LANE * LANE * 4 + LANE * 4)     # final linear W / b (f32)
        + 2 * g_pad * LANE * 4                 # pooled accumulator + output block
        + tm * n_pad * 6                       # int8 -> bf16 upcast intermediates
    )
    adj_resident = fixed_vmem + 2 * n_pad * n_pad <= int(0.70 * vmem_cap)
    adj_vmem = (2 * n_pad * n_pad) if adj_resident else (2 * tm * n_pad)
    vmem_limit = int(min(max(fixed_vmem + adj_vmem + (8 << 20), 16 << 20),
                         int(0.85 * vmem_cap)))

    # --- operand preparation (lane-dense 128 padding everywhere the MXU is fed) ---
    a_plus_i, d_inv_sqrt = _self_loop_adjacency(edge_index, n)
    # TODO(synk): >127 parallel edges between one node pair would overflow int8.
    adj = jnp.pad(a_plus_i, ((0, n_pad - n), (0, n_pad - n))).astype(jnp.int8)

    dscale = jnp.pad(d_inv_sqrt, (0, n_pad - n)).astype(jnp.float32)
    dscale = jnp.broadcast_to(dscale[:, None], (n_pad, LANE))

    x_p = jnp.pad(x, ((0, n_pad - n), (0, LANE - f_in))).astype(jnp.bfloat16)

    pool = _mean_pool_matrix(batch, num_graphs)
    pool = jnp.pad(pool, ((0, g_pad - num_graphs), (0, n_pad - n))).astype(jnp.float32)

    def pad_w(w, dtype):
        return jnp.pad(w, ((0, LANE - w.shape[0]), (0, LANE - w.shape[1]))).astype(dtype)

    def pad_b(b):
        return jnp.pad(b, (0, LANE - b.shape[0])).astype(jnp.float32).reshape(1, LANE)

    w_stack = jnp.stack([pad_w(params["w1"], jnp.bfloat16),
                         pad_w(params["w2"], jnp.bfloat16),
                         pad_w(params["w3"], jnp.bfloat16)])
    b_stack = jnp.stack([pad_b(params["b1"]), pad_b(params["b2"]), pad_b(params["b3"])])
    w_lin = pad_w(params["w_lin"], jnp.float32)
    b_lin = pad_b(params["b_lin"])

    # Advisory cost estimate for XLA scheduling around the custom call.
    flops = (num_layers * (2 * n_pad * LANE * LANE + 2 * n_pad * n_pad * LANE)
             + 2 * g_pad * n_pad * LANE + 2 * g_pad * LANE * LANE)
    adj_reads = 1 if adj_resident else num_layers
    bytes_accessed = (adj_reads * n_pad * n_pad + x_p.size * 2 + dscale.size * 4
                      + w_stack.size * 2 + b_stack.size * 4
                      + num_layers * pool.size * 4 + w_lin.size * 4 + b_lin.size * 4
                      + g_pad * LANE * 4)
    cost = pl.CostEstimate(flops=int(flops), transcendentals=0,
                           bytes_accessed=int(bytes_accessed))

    if adj_resident:
        # Whole padded adjacency lives in VMEM; constant index map -> one HBM DMA
        # total instead of one per layer.
        adj_spec = pl.BlockSpec((n_pad, n_pad), lambda l, i: (0, 0))
    else:
        adj_spec = pl.BlockSpec((tm, n_pad), lambda l, i: (i, 0))

    out = pl.pallas_call(
        functools.partial(_fused_gcn_kernel, tm=tm, num_layers=num_layers,
                          adj_resident=adj_resident),
        out_shape=jax.ShapeDtypeStruct((g_pad, LANE), jnp.float32),
        grid_spec=pltpu.PrefetchScalarGridSpec(
            num_scalar_prefetch=0,
            grid=(num_layers, n_row_tiles),
            in_specs=[
                adj_spec,                                               # (A+I) int8
                pl.BlockSpec((n_pad, LANE), lambda l, i: (0, 0)),       # features
                pl.BlockSpec((n_pad, LANE), lambda l, i: (0, 0)),       # D^-1/2 rows
                pl.BlockSpec((1, LANE, LANE), lambda l, i: (l, 0, 0)),  # layer weight
                pl.BlockSpec((1, 1, LANE), lambda l, i: (l, 0, 0)),     # layer bias
                pl.BlockSpec((g_pad, tm), lambda l, i: (0, i)),         # pool tile
                pl.BlockSpec((LANE, LANE), lambda l, i: (0, 0)),        # final linear W
                pl.BlockSpec((1, LANE), lambda l, i: (0, 0)),           # final linear b
            ],
            out_specs=pl.BlockSpec((g_pad, LANE), lambda l, i: (0, 0)),
            scratch_shapes=[
                pltpu.VMEM((2, n_pad, LANE), jnp.bfloat16),   # activation ping-pong
                pltpu.VMEM((n_pad, LANE), jnp.bfloat16),      # hoisted (H@W)*D^-1/2
                pltpu.VMEM((g_pad, LANE), jnp.float32),       # pooled accumulator
            ],
        ),
        compiler_params=pltpu.CompilerParams(
            # Layer axis is sequential; row tiles share the VMEM activation scratch
            # across layers, so neither axis can be split across TensorCores here.
            dimension_semantics=("arbitrary", "arbitrary"),
            vmem_limit_bytes=vmem_limit,
        ),
        cost_estimate=cost,
    )(adj, x_p, dscale, w_stack, b_stack, pool, w_lin, b_lin)

    return out[:num_graphs, :n_classes]


# ----------------------------------------------------------------------------
# Pure-JAX f32 reference (for a tolerance-asserted correctness check)
# ----------------------------------------------------------------------------
def gcn_reference(params, x, edge_index, batch, num_graphs):
    a, d = _self_loop_adjacency(edge_index, x.shape[0])
    adj_norm = d[:, None] * a * d[None, :]
    h = adj_norm @ (x @ params["w1"]) + params["b1"]
    h = jnp.maximum(h, 0.0)
    h = adj_norm @ (h @ params["w2"]) + params["b2"]
    h = jnp.maximum(h, 0.0)
    h = adj_norm @ (h @ params["w3"]) + params["b3"]
    pooled = _mean_pool_matrix(batch, num_graphs) @ h
    return pooled @ params["w_lin"] + params["b_lin"]


def init_params(key, num_node_features, hidden_channels, num_classes):
    ks = jax.random.split(key, 4)

    def glorot(k, fan_in, fan_out):
        lim = (6.0 / (fan_in + fan_out)) ** 0.5
        return jax.random.uniform(k, (fan_in, fan_out), jnp.float32, -lim, lim)

    return {
        "w1": glorot(ks[0], num_node_features, hidden_channels),
        "b1": jnp.zeros((hidden_channels,), jnp.float32),
        "w2": glorot(ks[1], hidden_channels, hidden_channels),
        "b2": jnp.zeros((hidden_channels,), jnp.float32),
        "w3": glorot(ks[2], hidden_channels, hidden_channels),
        "b3": jnp.zeros((hidden_channels,), jnp.float32),
        "w_lin": glorot(ks[3], hidden_channels, num_classes),
        "b_lin": jnp.zeros((num_classes,), jnp.float32),
    }


if __name__ == "__main__":
    # Small synthetic graph batch. (The reference module's global num_node_features
    # is 0 / unset; we pick a small nonzero feature dim.)
    NUM_NODES = 256
    NUM_NODE_FEATURES = 16
    HIDDEN = 32
    NUM_CLASSES = 2
    NUM_GRAPHS = 2

    key = jax.random.PRNGKey(0)
    k_x, k_p = jax.random.split(key)

    x = jax.random.normal(k_x, (NUM_NODES, NUM_NODE_FEATURES), jnp.float32)

    # batch assignment: first half -> graph 0, second half -> graph 1
    batch = jnp.concatenate(
        [jnp.zeros((NUM_NODES // 2,), jnp.int32),
         jnp.ones((NUM_NODES - NUM_NODES // 2,), jnp.int32)])

    # deterministic undirected ring edges within each graph
    def ring_edges(start, count):
        idx = jnp.arange(count, dtype=jnp.int32)
        src = start + idx
        dst = start + (idx + 1) % count
        return jnp.stack(
            [jnp.concatenate([src, dst]), jnp.concatenate([dst, src])], axis=0)

    e0 = ring_edges(0, NUM_NODES // 2)
    e1 = ring_edges(NUM_NODES // 2, NUM_NODES - NUM_NODES // 2)
    edge_index = jnp.concatenate([e0, e1], axis=1)        # [2, E]

    params = init_params(k_p, NUM_NODE_FEATURES, HIDDEN, NUM_CLASSES)

    fwd = jax.jit(functools.partial(gcn_forward, num_graphs=NUM_GRAPHS))
    out = jax.block_until_ready(fwd(params, x, edge_index, batch))
    assert out.shape == (NUM_GRAPHS, NUM_CLASSES)

    # Tolerance-asserted f32 reference check (kernel runs bf16 activations/weights,
    # so a loose tolerance is expected and sufficient to catch algorithmic errors).
    ref = gcn_reference(params, x, edge_index, batch, NUM_GRAPHS)
    err = float(jnp.max(jnp.abs(out - ref)))
    scale = float(jnp.max(jnp.abs(ref))) + 1e-6
    assert err <= 0.05 + 0.05 * scale, f"kernel/reference mismatch: {err} vs {scale}"

    print("KERNEL_OK")
</pallas_src>

<mosaic_0001>
module attributes {stable_mosaic.version = 11 : i64} {
  func.func @_fused_gcn_kernel(%arg0: i32, %arg1: i32, %arg2: memref<256x256xi8, #tpu.memory_space<vmem>>, %arg3: memref<256x128xbf16, #tpu.memory_space<vmem>>, %arg4: memref<256x128xf32, #tpu.memory_space<vmem>>, %arg5: memref<1x128x128xbf16, #tpu.memory_space<vmem>>, %arg6: memref<1x1x128xf32, #tpu.memory_space<vmem>>, %arg7: memref<8x256xf32, #tpu.memory_space<vmem>>, %arg8: memref<128x128xf32, #tpu.memory_space<vmem>>, %arg9: memref<1x128xf32, #tpu.memory_space<vmem>>, %arg10: memref<8x128xf32, #tpu.memory_space<vmem>>, %arg11: memref<2x256x128xbf16, #tpu.memory_space<vmem>>, %arg12: memref<256x128xbf16, #tpu.memory_space<vmem>>, %arg13: memref<8x128xf32, #tpu.memory_space<vmem>>) attributes {dimension_semantics = [#tpu.dimension_semantics<arbitrary>, #tpu.dimension_semantics<arbitrary>], iteration_bounds = array<i64: 3, 1>, scalar_prefetch = 0 : i64, scratch_operands = 3 : i64, tpu.core_type = #tpu.core_type<tc>, window_params = [{pipeline_mode = #tpu.pipeline_mode<synchronous>, transform_indices = @transform_0, window_bounds = array<i64: 256, 256>}, {pipeline_mode = #tpu.pipeline_mode<synchronous>, transform_indices = @transform_1, window_bounds = array<i64: 256, 128>}, {pipeline_mode = #tpu.pipeline_mode<synchronous>, transform_indices = @transform_2, window_bounds = array<i64: 256, 128>}, {transform_indices = @transform_3, window_bounds = array<i64: 1, 128, 128>}, {transform_indices = @transform_4, window_bounds = array<i64: 1, 1, 128>}, {transform_indices = @transform_5, window_bounds = array<i64: 8, 256>}, {pipeline_mode = #tpu.pipeline_mode<synchronous>, transform_indices = @transform_6, window_bounds = array<i64: 128, 128>}, {pipeline_mode = #tpu.pipeline_mode<synchronous>, transform_indices = @transform_7, window_bounds = array<i64: 1, 128>}, {pipeline_mode = #tpu.pipeline_mode<synchronous>, transform_indices = @transform_8, window_bounds = array<i64: 8, 128>}]} {
    %c0_i32 = arith.constant 0 : i32
    %0 = arith.cmpi eq, %arg0, %c0_i32 : i32
    %c0_i32_0 = arith.constant 0 : i32
    %1 = arith.cmpi eq, %arg1, %c0_i32_0 : i32
    %2 = arith.andi %0, %1 : i1
    %3 = arith.extui %2 : i1 to i32
    %c0_i32_1 = arith.constant 0 : i32
    %4 = arith.cmpi ne, %3, %c0_i32_1 : i32
    scf.if %4 {
      %c0_16 = arith.constant 0 : index
      %c0_17 = arith.constant 0 : index
      %34 = vector.load %arg3[%c0_16, %c0_17] : memref<256x128xbf16, #tpu.memory_space<vmem>>, vector<256x128xbf16>
      %c0_18 = arith.constant 0 : index
      %c0_19 = arith.constant 0 : index
      %c0_20 = arith.constant 0 : index
      %35 = vector.load %arg11[%c0_18, %c0_19, %c0_20] : memref<2x256x128xbf16, #tpu.memory_space<vmem>>, vector<1x256x128xbf16>
      %36 = vector.shape_cast %35 : vector<1x256x128xbf16> to vector<256x128xbf16>
      %37 = vector.shape_cast %34 : vector<256x128xbf16> to vector<1x256x128xbf16>
      tpu.vector_store %arg11[%c0_18, %c0_19, %c0_20], %37 {strides = array<i32>} : memref<2x256x128xbf16, #tpu.memory_space<vmem>>, vector<1x256x128xbf16>,
      %cst_21 = arith.constant 0.000000e+00 : f32
      %38 = vector.broadcast %cst_21 : f32 to vector<8x128xf32>
      %c0_22 = arith.constant 0 : index
      %c0_23 = arith.constant 0 : index
      %39 = vector.load %arg13[%c0_22, %c0_23] : memref<8x128xf32, #tpu.memory_space<vmem>>, vector<8x128xf32>
      tpu.vector_store %arg13[%c0_22, %c0_23], %38 {strides = array<i32>} : memref<8x128xf32, #tpu.memory_space<vmem>>, vector<8x128xf32>,
    } else {
    }
    %c0_i32_2 = arith.constant 0 : i32
    %5 = arith.cmpi eq, %arg1, %c0_i32_2 : i32
    %6 = arith.extui %5 : i1 to i32
    %c0_i32_3 = arith.constant 0 : i32
    %7 = arith.cmpi ne, %6, %c0_i32_3 : i32
    scf.if %7 {
      %c2_i32_16 = arith.constant 2 : i32
      %c0_i32_17 = arith.constant 0 : i32
      %34 = arith.cmpi eq, %c2_i32_16, %c0_i32_17 : i32
      %c1_i32 = arith.constant 1 : i32
      %35 = arith.select %34, %c1_i32, %c2_i32_16 : i32
      %36 = arith.remsi %arg0, %35 : i32
      %c0_i32_18 = arith.constant 0 : i32
      %37 = arith.cmpi ne, %36, %c0_i32_18 : i32
      %c0_i32_19 = arith.constant 0 : i32
      %38 = arith.cmpi slt, %36, %c0_i32_19 : i32
      %c0_i32_20 = arith.constant 0 : i32
      %39 = arith.cmpi slt, %35, %c0_i32_20 : i32
      %40 = arith.xori %38, %39 : i1
      %41 = arith.andi %40, %37 : i1
      %42 = arith.addi %36, %35 : i32
      %43 = arith.select %41, %42, %36 : i32
      %44 = arith.index_cast %43 : i32 to index
      %c0_21 = arith.constant 0 : index
      %c0_22 = arith.constant 0 : index
      %45 = vector.load %arg11[%44, %c0_21, %c0_22] : memref<2x256x128xbf16, #tpu.memory_space<vmem>>, vector<1x256x128xbf16>
      %46 = vector.shape_cast %45 : vector<1x256x128xbf16> to vector<256x128xbf16>
      %c0_23 = arith.constant 0 : index
      %c0_24 = arith.constant 0 : index
      %c0_25 = arith.constant 0 : index
      %47 = vector.load %arg5[%c0_23, %c0_24, %c0_25] : memref<1x128x128xbf16, #tpu.memory_space<vmem>>, vector<1x128x128xbf16>
      %48 = vector.shape_cast %47 : vector<1x128x128xbf16> to vector<128x128xbf16>
      %cst_26 = arith.constant dense<0.000000e+00> : vector<256x128xf32>
      %49 = tpu.matmul %46, %48, %cst_26 {dimension_numbers = #tpu.dot_dimension_numbers<[1], [0], [0], [1], [0, 0, 1, 1], [], []>} : vector<256x128xbf16>, vector<128x128xbf16>, vector<256x128xf32> -> vector<256x128xf32>
      %c0_27 = arith.constant 0 : index
      %c0_28 = arith.constant 0 : index
      %50 = vector.load %arg4[%c0_27, %c0_28] : memref<256x128xf32, #tpu.memory_space<vmem>>, vector<256x128xf32>
      %51 = arith.mulf %49, %50 : vector<256x128xf32>
      %52 = arith.truncf %51 : vector<256x128xf32> to vector<256x128xbf16>
      %c0_29 = arith.constant 0 : index
      %c0_30 = arith.constant 0 : index
      %53 = vector.load %arg12[%c0_29, %c0_30] : memref<256x128xbf16, #tpu.memory_space<vmem>>, vector<256x128xbf16>
      tpu.vector_store %arg12[%c0_29, %c0_30], %52 {strides = array<i32>} : memref<256x128xbf16, #tpu.memory_space<vmem>>, vector<256x128xbf16>,
    } else {
    }
    %c256_i32 = arith.constant 256 : i32
    %8 = arith.muli %arg1, %c256_i32 : i32
    %9 = tpu.assume_multiple %8, 256 : i32
    %10 = arith.index_cast %9 : i32 to index
    %c0 = arith.constant 0 : index
    %11 = vector.load %arg2[%10, %c0] : memref<256x256xi8, #tpu.memory_space<vmem>>, vector<256x256xi8>
    %12 = arith.sitofp %11 : vector<256x256xi8> to vector<256x256xf32>
    %13 = arith.truncf %12 : vector<256x256xf32> to vector<256x256xbf16>
    %c0_4 = arith.constant 0 : index
    %c0_5 = arith.constant 0 : index
    %14 = vector.load %arg12[%c0_4, %c0_5] : memref<256x128xbf16, #tpu.memory_space<vmem>>, vector<256x128xbf16>
    %cst = arith.constant dense<0.000000e+00> : vector<256x128xf32>
    %15 = tpu.matmul %13, %14, %cst {dimension_numbers = #tpu.dot_dimension_numbers<[1], [0], [0], [1], [0, 0, 1, 1], [], []>} : vector<256x256xbf16>, vector<256x128xbf16>, vector<256x128xf32> -> vector<256x128xf32>
    %16 = arith.index_cast %9 : i32 to index
    %c0_6 = arith.constant 0 : index
    %17 = vector.load %arg4[%16, %c0_6] : memref<256x128xf32, #tpu.memory_space<vmem>>, vector<256x128xf32>
    %18 = arith.mulf %17, %15 : vector<256x128xf32>
    %c0_7 = arith.constant 0 : index
    %c0_8 = arith.constant 0 : index
    %c0_9 = arith.constant 0 : index
    %19 = vector.load %arg6[%c0_7, %c0_8, %c0_9] : memref<1x1x128xf32, #tpu.memory_space<vmem>>, vector<1x1x128xf32>
    %20 = vector.shape_cast %19 : vector<1x1x128xf32> to vector<1x128xf32>
    %21 = vector.broadcast %20 : vector<1x128xf32> to vector<256x128xf32>
    %22 = arith.addf %18, %21 : vector<256x128xf32>
    %c2_i32 = arith.constant 2 : i32
    %23 = arith.cmpi slt, %arg0, %c2_i32 : i32
    %24 = arith.extui %23 : i1 to i32
    %c0_i32_10 = arith.constant 0 : i32
    %25 = arith.cmpi ne, %24, %c0_i32_10 : i32
    scf.if %25 {
      %cst_16 = arith.constant 0.000000e+00 : f32
      %34 = vector.broadcast %cst_16 : f32 to vector<256x128xf32>
      %35 = arith.maximumf %22, %34 : vector<256x128xf32>
      %36 = arith.truncf %35 : vector<256x128xf32> to vector<256x128xbf16>
      %c1_i32 = arith.constant 1 : i32
      %37 = arith.addi %arg0, %c1_i32 : i32
      %c2_i32_17 = arith.constant 2 : i32
      %c0_i32_18 = arith.constant 0 : i32
      %38 = arith.cmpi eq, %c2_i32_17, %c0_i32_18 : i32
      %c1_i32_19 = arith.constant 1 : i32
      %39 = arith.select %38, %c1_i32_19, %c2_i32_17 : i32
      %40 = arith.remsi %37, %39 : i32
      %c0_i32_20 = arith.constant 0 : i32
      %41 = arith.cmpi ne, %40, %c0_i32_20 : i32
      %c0_i32_21 = arith.constant 0 : i32
      %42 = arith.cmpi slt, %40, %c0_i32_21 : i32
      %c0_i32_22 = arith.constant 0 : i32
      %43 = arith.cmpi slt, %39, %c0_i32_22 : i32
      %44 = arith.xori %42, %43 : i1
      %45 = arith.andi %44, %41 : i1
      %46 = arith.addi %40, %39 : i32
      %47 = arith.select %45, %46, %40 : i32
      %48 = arith.index_cast %47 : i32 to index
      %49 = arith.index_cast %9 : i32 to index
      %c0_23 = arith.constant 0 : index
      %50 = vector.load %arg11[%48, %49, %c0_23] : memref<2x256x128xbf16, #tpu.memory_space<vmem>>, vector<1x256x128xbf16>
      %51 = vector.shape_cast %50 : vector<1x256x128xbf16> to vector<256x128xbf16>
      %52 = vector.shape_cast %36 : vector<256x128xbf16> to vector<1x256x128xbf16>
      tpu.vector_store %arg11[%48, %49, %c0_23], %52 {strides = array<i32>} : memref<2x256x128xbf16, #tpu.memory_space<vmem>>, vector<1x256x128xbf16>,
    } else {
    }
    %c2_i32_11 = arith.constant 2 : i32
    %26 = arith.cmpi eq, %arg0, %c2_i32_11 : i32
    %27 = arith.extui %26 : i1 to i32
    %c0_i32_12 = arith.constant 0 : i32
    %28 = arith.cmpi ne, %27, %c0_i32_12 : i32
    scf.if %28 {
      %c0_16 = arith.constant 0 : index
      %c0_17 = arith.constant 0 : index
      %34 = vector.load %arg13[%c0_16, %c0_17] : memref<8x128xf32, #tpu.memory_space<vmem>>, vector<8x128xf32>
      %c0_18 = arith.constant 0 : index
      %c0_19 = arith.constant 0 : index
      %35 = vector.load %arg7[%c0_18, %c0_19] : memref<8x256xf32, #tpu.memory_space<vmem>>, vector<8x256xf32>
      %cst_20 = arith.constant dense<0.000000e+00> : vector<8x128xf32>
      %36 = tpu.matmul %35, %22, %cst_20 {dimension_numbers = #tpu.dot_dimension_numbers<[1], [0], [0], [1], [0, 0, 1, 1], [], []>} : vector<8x256xf32>, vector<256x128xf32>, vector<8x128xf32> -> vector<8x128xf32>
      %37 = arith.addf %34, %36 : vector<8x128xf32>
      %c0_21 = arith.constant 0 : index
      %c0_22 = arith.constant 0 : index
      %38 = vector.load %arg13[%c0_21, %c0_22] : memref<8x128xf32, #tpu.memory_space<vmem>>, vector<8x128xf32>
      tpu.vector_store %arg13[%c0_21, %c0_22], %37 {strides = array<i32>} : memref<8x128xf32, #tpu.memory_space<vmem>>, vector<8x128xf32>,
    } else {
    }
    %c2_i32_13 = arith.constant 2 : i32
    %29 = arith.cmpi eq, %arg0, %c2_i32_13 : i32
    %c0_i32_14 = arith.constant 0 : i32
    %30 = arith.cmpi eq, %arg1, %c0_i32_14 : i32
    %31 = arith.andi %29, %30 : i1
    %32 = arith.extui %31 : i1 to i32
    %c0_i32_15 = arith.constant 0 : i32
    %33 = arith.cmpi ne, %32, %c0_i32_15 : i32
    scf.if %33 {
      %c0_16 = arith.constant 0 : index
      %c0_17 = arith.constant 0 : index
      %34 = vector.load %arg13[%c0_16, %c0_17] : memref<8x128xf32, #tpu.memory_space<vmem>>, vector<8x128xf32>
      %c0_18 = arith.constant 0 : index
      %c0_19 = arith.constant 0 : index
      %35 = vector.load %arg8[%c0_18, %c0_19] : memref<128x128xf32, #tpu.memory_space<vmem>>, vector<128x128xf32>
      %cst_20 = arith.constant dense<0.000000e+00> : vector<8x128xf32>
      %36 = tpu.matmul %34, %35, %cst_20 {dimension_numbers = #tpu.dot_dimension_numbers<[1], [0], [0], [1], [0, 0, 1, 1], [], []>} : vector<8x128xf32>, vector<128x128xf32>, vector<8x128xf32> -> vector<8x128xf32>
      %c0_21 = arith.constant 0 : index
      %c0_22 = arith.constant 0 : index
      %37 = vector.load %arg9[%c0_21, %c0_22] : memref<1x128xf32, #tpu.memory_space<vmem>>, vector<1x128xf32>
      %38 = vector.broadcast %37 : vector<1x128xf32> to vector<8x128xf32>
      %39 = arith.addf %36, %38 : vector<8x128xf32>
      %c0_23 = arith.constant 0 : index
      %c0_24 = arith.constant 0 : index
      %40 = vector.load %arg10[%c0_23, %c0_24] : memref<8x128xf32, #tpu.memory_space<vmem>>, vector<8x128xf32>
      tpu.vector_store %arg10[%c0_23, %c0_24], %39 {strides = array<i32>} : memref<8x128xf32, #tpu.memory_space<vmem>>, vector<8x128xf32>,
    } else {
    }
    return
  }
  func.func @transform_0(%arg0: i32, %arg1: i32) -> (i32, i32) {
    %c0_i32 = arith.constant 0 : i32
    %c0_i32_0 = arith.constant 0 : i32
    %c0_i32_1 = arith.constant 0 : i32
    return %c0_i32, %c0_i32_0 : i32, i32
  }
  func.func @transform_1(%arg0: i32, %arg1: i32) -> (i32, i32) {
    %c0_i32 = arith.constant 0 : i32
    %c0_i32_0 = arith.constant 0 : i32
    %c0_i32_1 = arith.constant 0 : i32
    return %c0_i32, %c0_i32_0 : i32, i32
  }
  func.func @transform_2(%arg0: i32, %arg1: i32) -> (i32, i32) {
    %c0_i32 = arith.constant 0 : i32
    %c0_i32_0 = arith.constant 0 : i32
    %c0_i32_1 = arith.constant 0 : i32
    return %c0_i32, %c0_i32_0 : i32, i32
  }
  func.func @transform_3(%arg0: i32, %arg1: i32) -> (i32, i32, i32) {
    %c0_i32 = arith.constant 0 : i32
    %c0_i32_0 = arith.constant 0 : i32
    %c0_i32_1 = arith.constant 0 : i32
    return %arg0, %c0_i32, %c0_i32_0 : i32, i32, i32
  }
  func.func @transform_4(%arg0: i32, %arg1: i32) -> (i32, i32, i32) {
    %c0_i32 = arith.constant 0 : i32
    %c0_i32_0 = arith.constant 0 : i32
    %c0_i32_1 = arith.constant 0 : i32
    return %arg0, %c0_i32, %c0_i32_0 : i32, i32, i32
  }
  func.func @transform_5(%arg0: i32, %arg1: i32) -> (i32, i32) {
    %c0_i32 = arith.constant 0 : i32
    %c0_i32_0 = arith.constant 0 : i32
    return %c0_i32, %arg1 : i32, i32
  }
  func.func @transform_6(%arg0: i32, %arg1: i32) -> (i32, i32) {
    %c0_i32 = arith.constant 0 : i32
    %c0_i32_0 = arith.constant 0 : i32
    %c0_i32_1 = arith.constant 0 : i32
    return %c0_i32, %c0_i32_0 : i32, i32
  }
  func.func @transform_7(%arg0: i32, %arg1: i32) -> (i32, i32) {
    %c0_i32 = arith.constant 0 : i32
    %c0_i32_0 = arith.constant 0 : i32
    %c0_i32_1 = arith.constant 0 : i32
    return %c0_i32, %c0_i32_0 : i32, i32
  }
  func.func @transform_8(%arg0: i32, %arg1: i32) -> (i32, i32) {
    %c0_i32 = arith.constant 0 : i32
    %c0_i32_0 = arith.constant 0 : i32
    %c0_i32_1 = arith.constant 0 : i32
    return %c0_i32, %c0_i32_0 : i32, i32
  }
}

</mosaic_0001>

<bundles_post_ra>
// kernel: gcn_forward.1
= control target key start
LH: loop header
LB: loop body
LE: loop exit
PB: predicated region body
PF: predicated region fallthrough
CT: control target
= control target key end

     0   :  { %s2250_s27 = smov 0   ;;  %s2252_s28 = smov 0   ;;  %s2934_s0 = inlined_call_operand.vmem [shape: s8[256,256], index: 0, kind: input, shape index: {}]   ;;  %s2935_s1 = inlined_call_operand.vmem [shape: bf16[256,128], index: 1, kind: input, shape index: {}]   ;;  %s2936_s2 = inlined_call_operand.vmem [shape: f32[256,128], index: 2, kind: input, shape index: {}]   ;;  %s2937_s3 = inlined_call_operand.vmem [shape: bf16[3,128,128], index: 3, kind: input, shape index: {}]   ;;  %s2938_s4 = inlined_call_operand.vmem [shape: f32[3,1,128], index: 4, kind: input, shape index: {}]   ;;  %s2939_s5 = inlined_call_operand.vmem [shape: f32[8,256], index: 5, kind: input, shape index: {}]   ;;  %s2940_s6 = inlined_call_operand.vmem [shape: f32[128,128], index: 6, kind: input, shape index: {}]   ;;  %s2941_s7 = inlined_call_operand.vmem [shape: f32[1,128], index: 7, kind: input, shape index: {}]   ;;  %s2942_s8 = inlined_call_operand.vmem [shape: f32[8,128], index: 8, kind: output, shape index: {}]  }
   0x1   :  { %s2254_s29 = smov 0  }
   0x2 LB: > { %s30_s30 = sadd.s32 1, %s2198_s28  ;;  %p1715_p0 = scmp.ge.s32.totalorder %s2202_s29, 1  ;;  %s2202_s29 = sphi %s2254_s29, %s18_s29   ;;  %s2198_s28 = sphi %s2252_s28, %s2944_s28   ;;  %s2194_s27 = sphi %s2250_s27, %s2943_s27  }
   0x3   : > { %p32_p1 = scmp.ge.s32.totalorder %s30_s30, 3  ;;  %p288_p2 = scmp.lt.s32.totalorder %s2202_s29, 4 }
   0x5   : > { %s2946_s30 = smov (%p32_p1, %s30_s30), 0  ;;  %p289_p3 = pnand %p1715_p0, %p288_p2 }
   0x6   : > { %p325_p4 = scmp.lt.s32.totalorder (!%p289_p3), %s2194_s27, 2  ;;  %p339_p5 = scmp.eq.s32.totalorder (!%p289_p3), %s2194_s27, 0 }
   0x7   : > { %292 = sbr.rel (%p289_p3) target bundleno = 1072 (0x430), region = 52 }
   0xc   : > { %s2273_s9 = scalar_select %p325_p4, %s2194_s27, 2  ;;  %v345_v0 = vld [vmem:[%s2935_s1] sm:$0xff] (%p339_p5)   ;;  %v347_v1 = vld [vmem:[%s2935_s1 + $0x8] sm:$0xff] (%p339_p5)   ;;  %v349_v2 = vld [vmem:[%s2935_s1 + $0x10] sm:$0xff] (%p339_p5)   ;;  %v2204_v16 = vmov (%p339_p5), 0.0  }
   0xd   : > { %344 = sbr.rel (!%p339_p5) target bundleno = 30 (0x1e), region = 56  ;;  %377 = vst [vmem:[#allocation2] sm:$0xff] (%p339_p5), %v345_v0   ;;  %v351_v3 = vld [vmem:[%s2935_s1 + $0x18] sm:$0xff] (%p339_p5)   ;;  %v353_v4 = vld [vmem:[%s2935_s1 + $0x20] sm:$0xff] (%p339_p5)   ;;  %v355_v5 = vld [vmem:[%s2935_s1 + $0x28] sm:$0xff] (%p339_p5)  }
   0xe   : > { %s1894_s10 = sshll.u32 %s2273_s9, 6  ;;  %s332_s13 = scalar_lea.vmem %s2938_s4, %s2273_s9  ;;  %379 = vst [vmem:[#allocation2 + $0x8] sm:$0xff] (%p339_p5), %v347_v1   ;;  %v357_v6 = vld [vmem:[%s2935_s1 + $0x30] sm:$0xff] (%p339_p5)   ;;  %v359_v7 = vld [vmem:[%s2935_s1 + $0x38] sm:$0xff] (%p339_p5)   ;;  %v361_v8 = vld [vmem:[%s2935_s1 + $0x40] sm:$0xff] (%p339_p5)  }
   0xf   : > { %s2283_s16 = scalar_lea.vmem %s2937_s3, %s1894_s10  ;;  %381 = vst [vmem:[#allocation2 + $0x10] sm:$0xff] (%p339_p5), %v349_v2   ;;  %v363_v9 = vld [vmem:[%s2935_s1 + $0x48] sm:$0xff] (%p339_p5)   ;;  %v365_v10 = vld [vmem:[%s2935_s1 + $0x50] sm:$0xff] (%p339_p5)   ;;  %v367_v11 = vld [vmem:[%s2935_s1 + $0x58] sm:$0xff] (%p339_p5)  }
  0x10   : > { %383 = vst [vmem:[#allocation2 + $0x18] sm:$0xff] (%p339_p5), %v351_v3   ;;  %v369_v12 = vld [vmem:[%s2935_s1 + $0x60] sm:$0xff] (%p339_p5)   ;;  %v371_v13 = vld [vmem:[%s2935_s1 + $0x68] sm:$0xff] (%p339_p5)   ;;  %v373_v14 = vld [vmem:[%s2935_s1 + $0x70] sm:$0xff] (%p339_p5)  }
  0x11   : > { %385 = vst [vmem:[#allocation2 + $0x20] sm:$0xff] (%p339_p5), %v353_v4   ;;  %v375_v15 = vld [vmem:[%s2935_s1 + $0x78] sm:$0xff] (%p339_p5)  }
  0x12   : > { %387 = vst [vmem:[#allocation2 + $0x28] sm:$0xff] %v355_v5  }
  0x13   : > { %389 = vst [vmem:[#allocation2 + $0x30] sm:$0xff] %v357_v6  }
  0x14   : > { %391 = vst [vmem:[#allocation2 + $0x38] sm:$0xff] %v359_v7  }
  0x15   : > { %393 = vst [vmem:[#allocation2 + $0x40] sm:$0xff] %v361_v8  }
  0x16   : > { %395 = vst [vmem:[#allocation2 + $0x48] sm:$0xff] %v363_v9  }
  0x17   : > { %397 = vst [vmem:[#allocation2 + $0x50] sm:$0xff] %v365_v10  }
  0x18   : > { %399 = vst [vmem:[#allocation2 + $0x58] sm:$0xff] %v367_v11  }
  0x19   : > { %401 = vst [vmem:[#allocation2 + $0x60] sm:$0xff] %v369_v12  }
  0x1a   : > { %403 = vst [vmem:[#allocation2 + $0x68] sm:$0xff] %v371_v13  }
  0x1b   : > { %405 = vst [vmem:[#allocation2 + $0x70] sm:$0xff] %v373_v14  }
  0x1c   : > { %407 = vst [vmem:[#allocation2 + $0x78] sm:$0xff] %v375_v15  }
  0x1d   : > { %409 = vst [vmem:[#allocation4] sm:$0xff] %v2204_v16 }
  0x1e PF: > { %v1920_v17 = vld [vmem:[%s2283_s16 + $0x38] sm:$0xff]  ;;  %s414_s19 = ssub.s32 0, %s2194_s27  ;;  %v1919_v18 = vld [vmem:[%s2283_s16 + $0x30] sm:$0xff]  ;;  %v1918_v19 = vld [vmem:[%s2283_s16 + $0x28] sm:$0xff]  ;;  %p413_p6 = scmp.lt.s32.totalorder %s2194_s27, 0 }
  0x1f   : > { %620 = vmatpush.bf16.msra.mxu0 %v1920_v17  ;;  %s1719_s20 = smin.u32 %s2194_s27, %s414_s19  ;;  %2129 = vmatpush.bf16.msra.mxu3 %v1920_v17  ;;  %v1917_v20 = vld [vmem:[%s2283_s16 + $0x20] sm:$0xff]  ;;  %v1916_v21 = vld [vmem:[%s2283_s16 + $0x18] sm:$0xff]  ;;  %v1915_v22 = vld [vmem:[%s2283_s16 + $0x10] sm:$0xff]  ;;  %p1884_p8 = scmp.ge.s32.totalorder %s2194_s27, 2 }
  0x20   : > { %s416_s21 = sand.u32 1, %s1719_s20   ;;  %v1914_v23 = vld [vmem:[%s2283_s16 + $0x8] sm:$0xff]  ;;  %v1913_v24 = vld [vmem:[%s2283_s16] sm:$0xff]  ;;  %v2387_v53 = vld [vmem:[%s2936_s2 + $0x10] sm:$0xff]  ;;  %s1494_s26 = sadd.s32 (!%p1884_p8), 1, %s2194_s27 }
  0x21   : > { %s417_s22 = ssub.s32 0, %s416_s21  ;;  %v2362_v39 = vld [vmem:[%s2936_s2] sm:$0xff]  ;;  %v2367_v40 = vld [vmem:[%s2936_s2 + $0x8] sm:$0xff]  ;;  %v2392_v54 = vld [vmem:[%s2936_s2 + $0x18] sm:$0xff]  ;;  %p1495_p9 = scmp.lt.s32.totalorder (!%p1884_p8), %s1494_s26, 0 }
  0x22   : > { %s2948_s22 = smov (!%p413_p6, %s417_s22), %s416_s21  ;;  %v2375_v48 = vld [vmem:[%s2936_s2 + $0xc0] sm:$0xff]  ;;  %v2381_v50 = vld [vmem:[%s2936_s2 + $0xc8] sm:$0xff]  ;;  %v2400_v63 = vld [vmem:[%s2936_s2 + $0xd0] sm:$0xff]  ;;  %s1496_s10 = ssub.s32 (!%p1884_p8), 0, %s1494_s26 }
  0x23   : > { %621 = vmatpush.bf16.msra.mxu0 %v1919_v18  ;;  %2130 = vmatpush.bf16.msra.mxu3 %v1919_v18  ;;  %p1721_p7 = scmp.lt.s32.totalorder %s2948_s22, 0  ;;  %s423_s23 = sadd.s32 2, %s2948_s22  ;;  %v2405_v0 = vld [vmem:[%s2936_s2 + $0xd8] sm:$0xff]  ;;  %v2412_v4 = vld [vmem:[%s2936_s2 + $0x20] sm:$0xff]  ;;  %v2417_v5 = vld [vmem:[%s2936_s2 + $0x28] sm:$0xff] }
  0x24   : > { %v2425_v14 = vld [vmem:[%s2936_s2 + $0xe0] sm:$0xff]  ;;  %v2430_v15 = vld [vmem:[%s2936_s2 + $0xe8] sm:$0xff]  ;;  %s1885_s11 = smin.u32 (!%p1884_p8), %s1496_s10, %s1494_s26 }
  0x25   : > { %s2950_s23 = smov (!%p1721_p7, %s423_s23), %s2948_s22  ;;  %s1498_s12 = sand.u32 (!%p1884_p8), 1, %s1885_s11  }
  0x26   : > { %s1896_s24 = sshll.u32 %s2950_s23, 7  ;;  %s1499_s14 = ssub.s32 (!%p1884_p8), 0, %s1498_s12 }
  0x27   : > { %622 = vmatpush.bf16.msra.mxu0 %v1918_v19  ;;  %2131 = vmatpush.bf16.msra.mxu3 %v1918_v19  ;;  %s2344_s25 = scalar_lea.vmem [#allocation2], %s1896_s24  ;;  %v2437_v19 = vld [vmem:[%s2936_s2 + $0x30] sm:$0xff] }
  0x28   : > { %v1897_v25 = vld [vmem:[%s2344_s25] sm:$0xff]  ;;  %v1898_v27 = vld [vmem:[%s2344_s25 + $0x8] sm:$0xff]  ;;  %v1899_v29 = vld [vmem:[%s2344_s25 + $0x10] sm:$0xff] }
  0x29   : > { %v1909_v26 = vld [vmem:[%s2344_s25 + $0x60] sm:$0xff]  ;;  %v1910_v28 = vld [vmem:[%s2344_s25 + $0x68] sm:$0xff]  ;;  %v1911_v30 = vld [vmem:[%s2344_s25 + $0x70] sm:$0xff] }
  0x2a   : > { %v1900_v31 = vld [vmem:[%s2344_s25 + $0x18] sm:$0xff]  ;;  %v1901_v33 = vld [vmem:[%s2344_s25 + $0x20] sm:$0xff]  ;;  %v1902_v34 = vld [vmem:[%s2344_s25 + $0x28] sm:$0xff] }
  0x2b   : > { %623 = vmatpush.bf16.msra.mxu0 %v1917_v20  ;;  %2132 = vmatpush.bf16.msra.mxu3 %v1917_v20  ;;  %v1912_v32 = vld [vmem:[%s2344_s25 + $0x78] sm:$0xff]  ;;  %v1903_v35 = vld [vmem:[%s2344_s25 + $0x30] sm:$0xff]  ;;  %v1905_v37 = vld [vmem:[%s2344_s25 + $0x40] sm:$0xff] }
  0x2c   : > { %v1904_v36 = vld [vmem:[%s2344_s25 + $0x38] sm:$0xff]  ;;  %v1906_v46 = vld [vmem:[%s2344_s25 + $0x48] sm:$0xff]  ;;  %v1907_v61 = vld [vmem:[%s2344_s25 + $0x50] sm:$0xff] }
  0x2d   : > { %v1908_v12 = vld [vmem:[%s2344_s25 + $0x58] sm:$0xff] }
  0x2e   : > { %v2442_v20 = vld [vmem:[%s2936_s2 + $0x38] sm:$0xff] }
  0x2f   : > { %624 = vmatpush.bf16.msra.mxu0 %v1916_v21  ;;  %2133 = vmatpush.bf16.msra.mxu3 %v1916_v21 }
  0x33   : > { %625 = vmatpush.bf16.msra.mxu0 %v1915_v22  ;;  %2134 = vmatpush.bf16.msra.mxu3 %v1915_v22 }
  0x37   : > { %626 = vmatpush.bf16.msra.mxu0 %v1914_v23  ;;  %2135 = vmatpush.bf16.msra.mxu3 %v1914_v23 }
  0x3b   : > { %627 = vmatpush.bf16.msra.mxu0 %v1913_v24  ;;  %2136 = vmatpush.bf16.msra.mxu3 %v1913_v24 }
  0x3e   : > { %628 = vmatmul.bf16.vlgmr.msra.gmra.mxu0 %v1897_v25  ;;  %688 = vmatmul.bf16.vlgmr.msra.gmra.mxu3 %v1909_v26 }
  0x4e   : > { %633 = vmatmul.bf16.gmra.mxu0 %v1898_v27  ;;  %693 = vmatmul.bf16.gmra.mxu3 %v1910_v28  ;;  %v2449_v28 = vld [vmem:[%s2936_s2 + $0xf0] sm:$0xff] }
  0x5e   : > { %638 = vmatmul.bf16.gmra.mxu0 %v1899_v29  ;;  %698 = vmatmul.bf16.gmra.mxu3 %v1911_v30  ;;  %v2454_v29 = vld [vmem:[%s2936_s2 + $0xf8] sm:$0xff] }
  0x6e   : > { %643 = vmatmul.bf16.gmra.mxu0 %v1900_v31  ;;  %703 = vmatmul.bf16.gmra.mxu3 %v1912_v32 }
  0x7e   : > { %648 = vmatmul.bf16.gmra.mxu0 %v1901_v33  ;;  %v2461_v33 = vld [vmem:[%s2936_s2 + $0x40] sm:$0xff] }
  0x8e   : > { %653 = vmatmul.bf16.gmra.mxu0 %v1902_v34  ;;  %v2466_v34 = vld [vmem:[%s2936_s2 + $0x48] sm:$0xff] }
  0x9e   : > { %658 = vmatmul.bf16.gmra.mxu0 %v1903_v35 }
  0xae   : > { %663 = vmatmul.bf16.gmra.mxu0 %v1904_v36 }
  0xbb   : > { %v629_v38 = vpop.f32.mrf.mxu0 }
  0xbc   : > { %v741_v42 = vmul.f32 %v2362_v39, %v629_v38 }
  0xbe   : > { %668 = vmatmul.bf16.gmra.mxu0 %v1905_v37 }
  0xc1   : > { %v689_v45 = vpop.f32.mrf.mxu3 }
  0xc2   : > { %v765_v49 = vmul.f32 %v2375_v48, %v689_v45  ;;  %v2478_v45 = vld [vmem:[%s2936_s2 + $0x50] sm:$0xff] }
  0xc3   : > { %v631_v41 = vpop.f32.mrf.mxu0 }
  0xc4   : > { %v742_v43 = vmul.f32 %v2367_v40, %v631_v41 }
  0xc6   : > { %v1942_v44 = vpack.c.bf16 %v742_v43, %v741_v42 }
  0xc8   : > { %1943 = vst [vmem:[#allocation3 + $0x30] sm:$0xff] %v1942_v44  }
  0xc9   : > { %v691_v51 = vpop.f32.mrf.mxu3 }
  0xca   : > { %v766_v52 = vmul.f32 %v2381_v50, %v691_v51 }
  0xcb   : > { %v634_v47 = vpop.f32.mrf.mxu0 }
  0xcc   : > { %v2002_v55 = vpack.c.bf16 %v766_v52, %v765_v49  ;;  %v743_v57 = vmul.f32 %v2387_v53, %v634_v47 }
  0xce   : > { %673 = vmatmul.bf16.gmra.mxu0 %v1906_v46  ;;  %2110 = vst [vmem:[#allocation3 + $0x60] sm:$0xff] %v2002_v55   ;;  %v2483_v46 = vld [vmem:[%s2936_s2 + $0x58] sm:$0xff] }
  0xd1   : > { %v694_v60 = vpop.f32.mrf.mxu3 }
  0xd2   : > { %v767_v1 = vmul.f32 %v2400_v63, %v694_v60 }
  0xd3   : > { %v636_v56 = vpop.f32.mrf.mxu0 }
  0xd4   : > { %v744_v58 = vmul.f32 %v2392_v54, %v636_v56 }
  0xd5   : > { %v2491_v56 = vld [vmem:[#allocation3 + $0x60] sm:$0xff] }
  0xd6   : > { %v1947_v59 = vpack.c.bf16 %v744_v58, %v743_v57  ;;  %v2497_v58 = vld [vmem:[%s2936_s2 + $0x60] sm:$0xff] }
  0xd8   : > { %2099 = vst [vmem:[#allocation3] sm:$0xff] %v1947_v59   ;;  %v2502_v59 = vld [vmem:[%s2936_s2 + $0x68] sm:$0xff] }
  0xd9   : > { %v696_v2 = vpop.f32.mrf.mxu3 }
  0xda   : > { %v768_v3 = vmul.f32 %v2405_v0, %v696_v2 }
  0xdb   : > { %v639_v62 = vpop.f32.mrf.mxu0 }
  0xdc   : > { %v2007_v6 = vpack.c.bf16 %v768_v3, %v767_v1  ;;  %v745_v8 = vmul.f32 %v2412_v4, %v639_v62  ;;  %v2509_v3 = vld [vmem:[%s2936_s2 + $0x70] sm:$0xff] }
  0xde   : > { %678 = vmatmul.bf16.gmra.mxu0 %v1907_v61  ;;  %2111 = vst [vmem:[#allocation3 + $0x70] sm:$0xff] %v2007_v6   ;;  %v2514_v6 = vld [vmem:[%s2936_s2 + $0x78] sm:$0xff] }
  0xe1   : > { %v699_v11 = vpop.f32.mrf.mxu3 }
  0xe2   : > { %v769_v16 = vmul.f32 %v2425_v14, %v699_v11 }
  0xe3   : > { %v641_v7 = vpop.f32.mrf.mxu0 }
  0xe4   : > { %v746_v9 = vmul.f32 %v2417_v5, %v641_v7 }
  0xe5   : > { %v2486_v49 = vld [vmem:[#allocation3 + $0x70] sm:$0xff] }
  0xe6   : > { %v1952_v10 = vpack.c.bf16 %v746_v9, %v745_v8 }
  0xe8   : > { %2100 = vst [vmem:[#allocation3 + $0x58] sm:$0xff] %v1952_v10  }
  0xe9   : > { %v701_v17 = vpop.f32.mrf.mxu3 }
  0xea   : > { %v770_v18 = vmul.f32 %v2430_v15, %v701_v17 }
  0xeb   : > { %v644_v13 = vpop.f32.mrf.mxu0 }
  0xec   : > { %v2012_v21 = vpack.c.bf16 %v770_v18, %v769_v16  ;;  %v747_v23 = vmul.f32 %v2437_v19, %v644_v13  ;;  %v2521_v13 = vld [vmem:[%s2936_s2 + $0x80] sm:$0xff]  ;;  %v2526_v16 = vld [vmem:[%s2936_s2 + $0x88] sm:$0xff] }
  0xee   : > { %683 = vmatmul.bf16.gmra.mxu0 %v1908_v12  ;;  %2112 = vst [vmem:[#allocation3 + $0x78] sm:$0xff] %v2012_v21  }
  0xf1   : > { %v704_v26 = vpop.f32.mrf.mxu3 }
  0xf2   : > { %v771_v30 = vmul.f32 %v2449_v28, %v704_v26 }
  0xf3   : > { %v646_v22 = vpop.f32.mrf.mxu0 }
  0xf4   : > { %v748_v24 = vmul.f32 %v2442_v20, %v646_v22 }
  0xf5   : > { %v2473_v44 = vld [vmem:[#allocation3 + $0x78] sm:$0xff] }
  0xf6   : > { %v1957_v25 = vpack.c.bf16 %v748_v24, %v747_v23 }
  0xf8   : > { %2101 = vst [vmem:[#allocation3 + $0x18] sm:$0xff] %v1957_v25  }
  0xf9   : > { %v706_v31 = vpop.f32.mrf.mxu3 }
  0xfa   : > { %v772_v32 = vmul.f32 %v2454_v29, %v706_v31  ;;  %v2538_v31 = vld [vmem:[%s2936_s2 + $0x98] sm:$0xff] }
  0xfb   : > { %v649_v27 = vpop.f32.mrf.mxu0 }
  0xfc   : > { %v2017_v35 = vpack.c.bf16 %v772_v32, %v771_v30  ;;  %v749_v37 = vmul.f32 %v2461_v33, %v649_v27  ;;  %v2533_v30 = vld [vmem:[%s2936_s2 + $0x90] sm:$0xff] }
  0xfe   : > { %2113 = vst [vmem:[#allocation3 + $0x28] sm:$0xff] %v2017_v35   ;;  %v1923_v35 = vld [vmem:[#allocation3 + $0x58] sm:$0xff] }
  0xff   : > { %v1924_v27 = vld [vmem:[#allocation3 + $0x18] sm:$0xff] }
 0x103   : > { %v651_v36 = vpop.f32.mrf.mxu0 }
 0x104   : > { %v750_v38 = vmul.f32 %v2466_v34, %v651_v36 }
 0x105   : > { %v2470_v43 = vld [vmem:[#allocation3 + $0x28] sm:$0xff] }
 0x106   : > { %v1962_v41 = vpack.c.bf16 %v750_v38, %v749_v37  ;;  %1236 = vmatpush.bf16.msra.mxu2 %v2470_v43 }
 0x108   : > { %2102 = vst [vmem:[#allocation3 + $0x50] sm:$0xff] %v1962_v41   ;;  %v1922_v41 = vld [vmem:[#allocation3] sm:$0xff] }
 0x10a   : > { %1237 = vmatpush.bf16.msra.mxu2 %v2473_v44 }
 0x10b   : > { %v654_v42 = vpop.f32.mrf.mxu0 }
 0x10c   : > { %v751_v51 = vmul.f32 %v2478_v45, %v654_v42 }
 0x10e   : > { %1238 = vmatpush.bf16.msra.mxu2 %v2486_v49 }
 0x10f   : > { %v1925_v26 = vld [vmem:[#allocation3 + $0x50] sm:$0xff] }
 0x112   : > { %1239 = vmatpush.bf16.msra.mxu2 %v2491_v56 }
 0x113   : > { %v656_v47 = vpop.f32.mrf.mxu0 }
 0x114   : > { %v752_v52 = vmul.f32 %v2483_v46, %v656_v47  ;;  %v1921_v47 = vld [vmem:[#allocation3 + $0x30] sm:$0xff] }
 0x116   : > { %v1967_v55 = vpack.c.bf16 %v752_v52, %v751_v51  ;;  %v2546_v51 = vld [vmem:[%s2936_s2 + $0xa0] sm:$0xff]  ;;  %v2551_v52 = vld [vmem:[%s2936_s2 + $0xa8] sm:$0xff] }
 0x118   : > { %2103 = vst [vmem:[#allocation3 + $0x68] sm:$0xff] %v1967_v55   ;;  %v855_v55 = vld [vmem:[%s2934_s0 + $0x60] sm:$0xff] }
 0x11b   : > { %v659_v57 = vpop.f32.mrf.mxu0 }
 0x11c   : > { %v753_v61 = vmul.f32 %v2497_v58, %v659_v57  ;;  %v907_v57 = vunpack.c.0.s8 %v855_v55 }
 0x11f   : > { %v1926_v24 = vld [vmem:[#allocation3 + $0x68] sm:$0xff] }
 0x123   : > { %v661_v60 = vpop.f32.mrf.mxu0 }
 0x124   : > { %v754_v62 = vmul.f32 %v2502_v59, %v661_v60  ;;  %v909_v60 = vunpack.c.1.s8 %v855_v55 }
 0x126   : > { %v1972_v1 = vpack.c.bf16 %v754_v62, %v753_v61 }
 0x128   : > { %2104 = vst [vmem:[#allocation3 + $0x8] sm:$0xff] %v1972_v1   ;;  %v971_v1 = vcvt.s32.f32 %v907_v57  ;;  %v845_v57 = vld [vmem:[%s2934_s0 + $0x10] sm:$0xff] }
 0x12b   : > { %v664_v2 = vpop.f32.mrf.mxu0 }
 0x12c   : > { %v755_v8 = vmul.f32 %v2509_v3, %v664_v2  ;;  %v973_v2 = vcvt.s32.f32 %v909_v60  ;;  %v844_v60 = vld [vmem:[%s2934_s0 + $0x8] sm:$0xff] }
 0x12f   : > { %v1927_v18 = vld [vmem:[#allocation3 + $0x8] sm:$0xff] }
 0x133   : > { %v666_v7 = vpop.f32.mrf.mxu0 }
 0x134   : > { %v756_v9 = vmul.f32 %v2514_v6, %v666_v7 }
 0x136   : > { %v1977_v10 = vpack.c.bf16 %v756_v9, %v755_v8  ;;  %v1011_v8 = vpack.c.bf16 %v973_v2, %v971_v1  ;;  %v843_v9 = vld [vmem:[%s2934_s0] sm:$0xff]  ;;  %v869_v1 = vunpack.c.1.s8 %v845_v57 }
 0x138   : > { %2105 = vst [vmem:[#allocation3 + $0x48] sm:$0xff] %v1977_v10   ;;  %v861_v10 = vunpack.c.1.s8 %v843_v9 }
 0x13b   : > { %v669_v11 = vpop.f32.mrf.mxu0 }
 0x13c   : > { %v757_v21 = vmul.f32 %v2521_v13, %v669_v11 }
 0x13f   : > { %v1928_v12 = vld [vmem:[#allocation3 + $0x48] sm:$0xff] }
 0x140   : > { %1147 = vmatpush.bf16.msra.mxu1 %v1928_v12  ;;  %2137 = vmatpush.bf16.msrb.mxu3 %v1928_v12  ;;  %v925_v12 = vcvt.s32.f32 %v861_v10 }
 0x143   : > { %v671_v17 = vpop.f32.mrf.mxu0 }
 0x144   : > { %v758_v22 = vmul.f32 %v2526_v16, %v671_v17  ;;  %1148 = vmatpush.bf16.msra.mxu1 %v1927_v18  ;;  %2138 = vmatpush.bf16.msrb.mxu3 %v1927_v18 }
 0x146   : > { %v1982_v23 = vpack.c.bf16 %v758_v22, %v757_v21  ;;  %v911_v21 = vunpack.c.2.s8 %v855_v55  ;;  %v913_v22 = vunpack.c.3.s8 %v855_v55  ;;  %v857_v55 = vld [vmem:[%s2934_s0 + $0x70] sm:$0xff] }
 0x148   : > { %2106 = vst [vmem:[#allocation3 + $0x40] sm:$0xff] %v1982_v23   ;;  %1149 = vmatpush.bf16.msra.mxu1 %v1926_v24  ;;  %2139 = vmatpush.bf16.msrb.mxu3 %v1926_v24  ;;  %v2572_v23 = vld [vmem:[%s2936_s2 + $0xb8] sm:$0xff]  ;;  %v975_v24 = vcvt.s32.f32 %v911_v21 }
 0x14b   : > { %v674_v25 = vpop.f32.mrf.mxu0 }
 0x14c   : > { %1150 = vmatpush.bf16.msra.mxu1 %v1925_v26  ;;  %2140 = vmatpush.bf16.msrb.mxu3 %v1925_v26  ;;  %v759_v36 = vmul.f32 %v2533_v30, %v674_v25  ;;  %v977_v25 = vcvt.s32.f32 %v913_v22  ;;  %v865_v26 = vunpack.c.3.s8 %v843_v9 }
 0x150   : > { %1151 = vmatpush.bf16.msra.mxu1 %v1924_v27  ;;  %2141 = vmatpush.bf16.msrb.mxu3 %v1924_v27 }
 0x153   : > { %v676_v32 = vpop.f32.mrf.mxu0 }
 0x154   : > { %v760_v37 = vmul.f32 %v2538_v31, %v676_v32  ;;  %1152 = vmatpush.bf16.msra.mxu1 %v1923_v35  ;;  %2142 = vmatpush.bf16.msrb.mxu3 %v1923_v35 }
 0x156   : > { %v1987_v38 = vpack.c.bf16 %v760_v37, %v759_v36  ;;  %v1013_v36 = vpack.c.bf16 %v977_v25, %v975_v24  ;;  %v1929_v24 = vld [vmem:[#allocation3 + $0x40] sm:$0xff] }
 0x158   : > { %2107 = vst [vmem:[#allocation3 + $0x20] sm:$0xff] %v1987_v38   ;;  %1153 = vmatpush.bf16.msra.mxu1 %v1922_v41  ;;  %2143 = vmatpush.bf16.msrb.mxu3 %v1922_v41  ;;  %v929_v41 = vcvt.s32.f32 %v865_v26  ;;  %v921_v26 = vunpack.c.3.s8 %v857_v55 }
 0x15b   : > { %v679_v42 = vpop.f32.mrf.mxu0 }
 0x15c   : > { %1154 = vmatpush.bf16.msra.mxu1 %v1921_v47  ;;  %2144 = vmatpush.bf16.msrb.mxu3 %v1921_v47 }
 0x15f   : > { %1215 = vmatmul.bf16.vlgmr.msrb.gmra.mxu3 %v1011_v8 }
 0x160   : > { %2145 = vmatpush.bf16.msra.mxu3 %v2470_v43  ;;  %v761_v43 = vmul.f32 %v2546_v51, %v679_v42 }
 0x163   : > { %v681_v61 = vpop.f32.mrf.mxu0 }
 0x164   : > { %2146 = vmatpush.bf16.msra.mxu3 %v2473_v44  ;;  %v762_v62 = vmul.f32 %v2551_v52, %v681_v61  ;;  %v859_v44 = vunpack.c.0.s8 %v843_v9  ;;  %v915_v61 = vunpack.c.0.s8 %v857_v55 }
 0x166   : > { %v1992_v7 = vpack.c.bf16 %v762_v62, %v761_v43  ;;  %v923_v11 = vcvt.s32.f32 %v859_v44  ;;  %v917_v43 = vunpack.c.1.s8 %v857_v55  ;;  %v867_v62 = vunpack.c.0.s8 %v845_v57 }
 0x167   : > { %v862_v44 = vunpack.c.1.s8 %v844_v60 }
 0x168   : > { %2147 = vmatpush.bf16.msra.mxu3 %v2486_v49  ;;  %2108 = vst [vmem:[#allocation3 + $0x10] sm:$0xff] %v1992_v7   ;;  %v987_v18 = vpack.c.bf16 %v925_v12, %v923_v11  ;;  %v2567_v49 = vld [vmem:[%s2936_s2 + $0xb0] sm:$0xff]  ;;  %v979_v7 = vcvt.s32.f32 %v915_v61  ;;  %v981_v8 = vcvt.s32.f32 %v917_v43  ;;  %v931_v11 = vcvt.s32.f32 %v867_v62 }
 0x169   : > { %v933_v12 = vcvt.s32.f32 %v869_v1  ;;  %v926_v21 = vcvt.s32.f32 %v862_v44 }
 0x16a   : > { %1155 = vmatmul.bf16.vlgmr.msra.gmra.mxu1 %v987_v18  ;;  %v1015_v10 = vpack.c.bf16 %v981_v8, %v979_v7 }
 0x16b   : > { %v684_v17 = vpop.f32.mrf.mxu0  ;;  %v991_v22 = vpack.c.bf16 %v933_v12, %v931_v11 }
 0x16c   : > { %2148 = vmatpush.bf16.msra.mxu3 %v2491_v56  ;;  %v863_v56 = vunpack.c.2.s8 %v843_v9  ;;  %v763_v32 = vmul.f32 %v2567_v49, %v684_v17  ;;  %v860_v9 = vunpack.c.0.s8 %v844_v60  ;;  %v1930_v17 = vld [vmem:[#allocation3 + $0x20] sm:$0xff] }
 0x16e   : > { %v927_v38 = vcvt.s32.f32 %v863_v56  ;;  %v924_v18 = vcvt.s32.f32 %v860_v9  ;;  %v919_v56 = vunpack.c.2.s8 %v857_v55  ;;  %v856_v55 = vld [vmem:[%s2934_s0 + $0x68] sm:$0xff] }
 0x16f   : > { %1220 = vmatmul.bf16.gmra.mxu3 %v1013_v36  ;;  %v1931_v2 = vld [vmem:[#allocation3 + $0x10] sm:$0xff]  ;;  %v873_v36 = vunpack.c.3.s8 %v845_v57  ;;  %v910_v7 = vunpack.c.1.s8 %v856_v55 }
 0x170   : > { %v989_v42 = vpack.c.bf16 %v929_v41, %v927_v38  ;;  %v988_v25 = vpack.c.bf16 %v926_v21, %v924_v18  ;;  %v866_v38 = vunpack.c.3.s8 %v844_v60 }
 0x172   : > { %v930_v43 = vcvt.s32.f32 %v866_v38 }
 0x173   : > { %v686_v27 = vpop.f32.mrf.mxu0 }
 0x174   : > { %v764_v35 = vmul.f32 %v2572_v23, %v686_v27  ;;  %v983_v27 = vcvt.s32.f32 %v919_v56 }
 0x176   : > { %v1997_v37 = vpack.c.bf16 %v764_v35, %v763_v32  ;;  %v985_v32 = vcvt.s32.f32 %v921_v26  ;;  %v871_v35 = vunpack.c.2.s8 %v845_v57  ;;  %v847_v57 = vld [vmem:[%s2934_s0 + $0x20] sm:$0xff]  ;;  %v912_v26 = vunpack.c.2.s8 %v856_v55 }
 0x177   : > { %v875_v8 = vunpack.c.0.s8 %v847_v57  ;;  %v877_v9 = vunpack.c.1.s8 %v847_v57 }
 0x178   : > { %2109 = vst [vmem:[#allocation3 + $0x38] sm:$0xff] %v1997_v37   ;;  %v864_v37 = vunpack.c.2.s8 %v844_v60  ;;  %v1017_v41 = vpack.c.bf16 %v985_v32, %v983_v27  ;;  %v846_v60 = vld [vmem:[%s2934_s0 + $0x18] sm:$0xff]  ;;  %v914_v27 = vunpack.c.3.s8 %v856_v55  ;;  %v976_v32 = vcvt.s32.f32 %v912_v26 }
 0x179   : > { %v868_v11 = vunpack.c.0.s8 %v846_v60  ;;  %v870_v12 = vunpack.c.1.s8 %v846_v60  ;;  %v939_v18 = vcvt.s32.f32 %v875_v8  ;;  %v941_v21 = vcvt.s32.f32 %v877_v9 }
 0x17a   : > { %1160 = vmatmul.bf16.gmra.mxu1 %v989_v42  ;;  %v935_v42 = vcvt.s32.f32 %v871_v35  ;;  %v928_v61 = vcvt.s32.f32 %v864_v37  ;;  %v978_v35 = vcvt.s32.f32 %v914_v27  ;;  %v881_v37 = vunpack.c.3.s8 %v847_v57 }
 0x17b   : > { %v872_v38 = vunpack.c.2.s8 %v846_v60 }
 0x17c   : > { %v990_v1 = vpack.c.bf16 %v930_v43, %v928_v61  ;;  %v945_v61 = vcvt.s32.f32 %v881_v37 }
 0x17d   : > { %v936_v43 = vcvt.s32.f32 %v872_v38 }
 0x17f   : > { %v1932_v47 = vld [vmem:[#allocation3 + $0x38] sm:$0xff]  ;;  %1225 = vmatmul.bf16.gmra.mxu3 %v1015_v10  ;;  %v974_v10 = vcvt.s32.f32 %v910_v7 }
 0x180   : > { %1240 = vmatpush.bf16.msra.mxu2 %v1932_v47  ;;  %2149 = vmatpush.bf16.msra.mxu3 %v1932_v47  ;;  %v937_v47 = vcvt.s32.f32 %v873_v36  ;;  %v879_v36 = vunpack.c.2.s8 %v847_v57  ;;  %v849_v57 = vld [vmem:[%s2934_s0 + $0x30] sm:$0xff] }
 0x181   : > { %v883_v9 = vunpack.c.0.s8 %v849_v57  ;;  %v887_v37 = vunpack.c.2.s8 %v849_v57  ;;  %v889_v38 = vunpack.c.3.s8 %v849_v57 }
 0x182   : > { %v993_v62 = vpack.c.bf16 %v937_v47, %v935_v42  ;;  %v1014_v42 = vpack.c.bf16 %v978_v35, %v976_v32  ;;  %v943_v47 = vcvt.s32.f32 %v879_v36 }
 0x184   : > { %1241 = vmatpush.bf16.msra.mxu2 %v1931_v2  ;;  %2150 = vmatpush.bf16.msra.mxu3 %v1931_v2  ;;  %v908_v2 = vunpack.c.0.s8 %v856_v55  ;;  %v858_v55 = vld [vmem:[%s2934_s0 + $0x78] sm:$0xff] }
 0x185   : > { %v916_v7 = vunpack.c.0.s8 %v858_v55  ;;  %v918_v8 = vunpack.c.1.s8 %v858_v55  ;;  %v920_v27 = vunpack.c.2.s8 %v858_v55  ;;  %v922_v32 = vunpack.c.3.s8 %v858_v55  ;;  %v851_v55 = vld [vmem:[%s2934_s0 + $0x40] sm:$0xff] }
 0x186   : > { %v972_v44 = vcvt.s32.f32 %v908_v2 }
 0x187   : > { %v984_v35 = vcvt.s32.f32 %v920_v27  ;;  %v986_v36 = vcvt.s32.f32 %v922_v32 }
 0x188   : > { %1242 = vmatpush.bf16.msra.mxu2 %v1930_v17  ;;  %2151 = vmatpush.bf16.msra.mxu3 %v1930_v17  ;;  %v1012_v17 = vpack.c.bf16 %v974_v10, %v972_v44  ;;  %v885_v44 = vunpack.c.1.s8 %v849_v57  ;;  %v980_v10 = vcvt.s32.f32 %v916_v7  ;;  %v850_v57 = vld [vmem:[%s2934_s0 + $0x38] sm:$0xff] }
 0x189   : > { %v890_v27 = vunpack.c.3.s8 %v850_v57 }
 0x18a   : > { %1165 = vmatmul.bf16.gmra.mxu1 %v991_v22  ;;  %v932_v22 = vcvt.s32.f32 %v868_v11  ;;  %v982_v11 = vcvt.s32.f32 %v918_v8  ;;  %v891_v8 = vunpack.c.0.s8 %v851_v55 }
 0x18c   : > { %1243 = vmatpush.bf16.msra.mxu2 %v1929_v24  ;;  %2152 = vmatpush.bf16.msra.mxu3 %v1929_v24  ;;  %v934_v24 = vcvt.s32.f32 %v870_v12 }
 0x18e   : > { %v992_v56 = vpack.c.bf16 %v934_v24, %v932_v22  ;;  %v949_v22 = vcvt.s32.f32 %v885_v44  ;;  %v886_v44 = vunpack.c.1.s8 %v850_v57 }
 0x18f   : > { %1244 = vmatmul.bf16.vlgmr.msra.gmra.mxu2 %v988_v25  ;;  %1230 = vmatmul.bf16.gmra.mxu3 %v1017_v41  ;;  %v995_v25 = vpack.c.bf16 %v941_v21, %v939_v18  ;;  %v874_v41 = vunpack.c.3.s8 %v846_v60  ;;  %v848_v60 = vld [vmem:[%s2934_s0 + $0x28] sm:$0xff]  ;;  %v1016_v18 = vpack.c.bf16 %v982_v11, %v980_v10  ;;  %v947_v21 = vcvt.s32.f32 %v883_v9 }
 0x190   : > { %v876_v12 = vunpack.c.0.s8 %v848_v60  ;;  %v884_v9 = vunpack.c.0.s8 %v850_v57  ;;  %v955_v10 = vcvt.s32.f32 %v891_v8 }
 0x192   : > { %v940_v24 = vcvt.s32.f32 %v876_v12  ;;  %v948_v12 = vcvt.s32.f32 %v884_v9 }
 0x19a   : > { %1170 = vmatmul.bf16.gmra.mxu1 %v993_v62  ;;  %v938_v62 = vcvt.s32.f32 %v874_v41  ;;  %v880_v41 = vunpack.c.2.s8 %v848_v60 }
 0x19c   : > { %v994_v2 = vpack.c.bf16 %v938_v62, %v936_v43  ;;  %v953_v43 = vcvt.s32.f32 %v889_v38  ;;  %v944_v62 = vcvt.s32.f32 %v880_v41 }
 0x19f   : > { %1249 = vmatmul.bf16.gmra.mxu2 %v990_v1  ;;  %1304 = vmatmul.bf16.vlgmr.msra.gmra.mxu3 %v1012_v17  ;;  %v997_v1 = vpack.c.bf16 %v945_v61, %v943_v47  ;;  %v878_v17 = vunpack.c.1.s8 %v848_v60  ;;  %v1018_v47 = vpack.c.bf16 %v986_v36, %v984_v35  ;;  %v951_v61 = vcvt.s32.f32 %v887_v37 }
 0x1a0   : > { %v954_v35 = vcvt.s32.f32 %v890_v27  ;;  %v895_v36 = vunpack.c.2.s8 %v851_v55  ;;  %v897_v37 = vunpack.c.3.s8 %v851_v55 }
 0x1a2   : > { %v959_v38 = vcvt.s32.f32 %v895_v36  ;;  %v961_v41 = vcvt.s32.f32 %v897_v37 }
 0x1aa   : > { %1175 = vmatmul.bf16.gmra.mxu1 %v995_v25  ;;  %v942_v25 = vcvt.s32.f32 %v878_v17  ;;  %v950_v17 = vcvt.s32.f32 %v886_v44 }
 0x1ac   : > { %v996_v26 = vpack.c.bf16 %v942_v25, %v940_v24  ;;  %v1000_v24 = vpack.c.bf16 %v950_v17, %v948_v12 }
 0x1af   : > { %1254 = vmatmul.bf16.gmra.mxu2 %v992_v56  ;;  %1309 = vmatmul.bf16.gmra.mxu3 %v1014_v42  ;;  %v999_v56 = vpack.c.bf16 %v949_v22, %v947_v21  ;;  %v882_v42 = vunpack.c.3.s8 %v848_v60  ;;  %v893_v60 = vunpack.c.1.s8 %v851_v55  ;;  %v853_v55 = vld [vmem:[%s2934_s0 + $0x50] sm:$0xff] }
 0x1b0   : > { %v899_v9 = vunpack.c.0.s8 %v853_v55  ;;  %v901_v44 = vunpack.c.1.s8 %v853_v55 }
 0x1b1   : > { %v957_v11 = vcvt.s32.f32 %v893_v60 }
 0x1ba   : > { %1180 = vmatmul.bf16.gmra.mxu1 %v997_v1  ;;  %v946_v1 = vcvt.s32.f32 %v882_v42 }
 0x1bc   : > { %v998_v7 = vpack.c.bf16 %v946_v1, %v944_v62  ;;  %v852_v62 = vld [vmem:[%s2934_s0 + $0x48] sm:$0xff] }
 0x1bd   : > { %v896_v27 = vunpack.c.2.s8 %v852_v62  ;;  %v898_v36 = vunpack.c.3.s8 %v852_v62 }
 0x1bf   : > { %1259 = vmatmul.bf16.gmra.mxu2 %v994_v2  ;;  %1314 = vmatmul.bf16.gmra.mxu3 %v1016_v18  ;;  %v1001_v2 = vpack.c.bf16 %v953_v43, %v951_v61  ;;  %v1003_v18 = vpack.c.bf16 %v957_v11, %v955_v10  ;;  %v1005_v43 = vpack.c.bf16 %v961_v41, %v959_v38  ;;  %v963_v10 = vcvt.s32.f32 %v899_v9 }
 0x1c0   : > { %v965_v11 = vcvt.s32.f32 %v901_v44  ;;  %v960_v41 = vcvt.s32.f32 %v896_v27 }
 0x1ca   : > { %1185 = vmatmul.bf16.gmra.mxu1 %v999_v56 }
 0x1cf   : > { %1264 = vmatmul.bf16.gmra.mxu2 %v996_v26  ;;  %1319 = vmatmul.bf16.gmra.mxu3 %v1018_v47  ;;  %v888_v26 = vunpack.c.2.s8 %v850_v57  ;;  %v894_v57 = vunpack.c.1.s8 %v852_v62 }
 0x1d1   : > { %v952_v32 = vcvt.s32.f32 %v888_v26  ;;  %v958_v60 = vcvt.s32.f32 %v894_v57  ;;  %v903_v57 = vunpack.c.2.s8 %v853_v55 }
 0x1d3   : > { %v1002_v61 = vpack.c.bf16 %v954_v35, %v952_v32  ;;  %v2630_v35 = vld [vmem:[%s332_s13] ss:$0 sm:$0xff] }
 0x1da   : > { %1190 = vmatmul.bf16.gmra.mxu1 %v1001_v2 }
 0x1df   : > { %1269 = vmatmul.bf16.gmra.mxu2 %v998_v7  ;;  %v892_v7 = vunpack.c.0.s8 %v852_v62 }
 0x1e1   : > { %v956_v8 = vcvt.s32.f32 %v892_v7  ;;  %v962_v7 = vcvt.s32.f32 %v898_v36 }
 0x1e2   : > { %v2609_v22 = vpop.f32.mrf.mxu3 }
 0x1e3   : > { %v1004_v17 = vpack.c.bf16 %v958_v60, %v956_v8  ;;  %v905_v8 = vunpack.c.3.s8 %v853_v55 }
 0x1e5   : > { %v969_v60 = vcvt.s32.f32 %v905_v8 }
 0x1e7   : > { %v1156_v21 = vpop.f32.mrf.mxu1 }
 0x1ea   : > { %1195 = vmatmul.bf16.gmra.mxu1 %v1003_v18  ;;  %v2611_v56 = vpop.f32.mrf.mxu3  ;;  %v1007_v18 = vpack.c.bf16 %v965_v11, %v963_v10  ;;  %v1006_v10 = vpack.c.bf16 %v962_v7, %v960_v41 }
 0x1ef   : > { %1274 = vmatmul.bf16.gmra.mxu2 %v1000_v24  ;;  %v1158_v25 = vpop.f32.mrf.mxu1 }
 0x1f2   : > { %v2613_v47 = vpop.f32.mrf.mxu3 }
 0x1f7   : > { %v1161_v42 = vpop.f32.mrf.mxu1 }
 0x1fa   : > { %1200 = vmatmul.bf16.gmra.mxu1 %v1005_v43  ;;  %v2618_v2 = vpop.f32.mrf.mxu3 }
 0x1ff   : > { %1279 = vmatmul.bf16.gmra.mxu2 %v1002_v61  ;;  %v1163_v1 = vpop.f32.mrf.mxu1 }
 0x202   : > { %v2623_v12 = vpop.f32.mrf.mxu3 }
 0x207   : > { %v1166_v24 = vpop.f32.mrf.mxu1 }
 0x20a   : > { %1205 = vmatmul.bf16.gmra.mxu1 %v1007_v18  ;;  %v2632_v37 = vpop.f32.mrf.mxu3  ;;  %v854_v18 = vld [vmem:[%s2934_s0 + $0x58] sm:$0xff] }
 0x20f   : > { %1284 = vmatmul.bf16.gmra.mxu2 %v1004_v17  ;;  %v1168_v61 = vpop.f32.mrf.mxu1 }
 0x212   : > { %v1245_v26 = vpop.f32.mrf.mxu2  ;;  %v2638_v11 = vpop.f32.mrf.mxu3 }
 0x213   : > { %v1246_v32 = vadd.f32 %v1245_v26, %v1156_v21  ;;  %v967_v21 = vcvt.s32.f32 %v903_v57 }
 0x215   : > { %v1358_v38 = vmul.f32 %v1246_v32, %v2362_v39  ;;  %v1009_v62 = vpack.c.bf16 %v969_v60, %v967_v21  ;;  %v900_v32 = vunpack.c.0.s8 %v854_v18 }
 0x217   : > { %v2636_v43 = vadd.f32 %v2630_v35, %v1358_v38  ;;  %v1171_v55 = vpop.f32.mrf.mxu1  ;;  %v964_v41 = vcvt.s32.f32 %v900_v32 }
 0x21a   : > { %v1247_v9 = vpop.f32.mrf.mxu2  ;;  %1210 = vmatmul.bf16.gmra.mxu1 %v1009_v62  ;;  %v2647_v36 = vpop.f32.mrf.mxu3 }
 0x21b   : > { %v1248_v44 = vadd.f32 %v1247_v9, %v1158_v25  ;;  %v902_v25 = vunpack.c.1.s8 %v854_v18 }
 0x21d   : > { %v1359_v17 = vmul.f32 %v1248_v44, %v2367_v40  ;;  %v966_v7 = vcvt.s32.f32 %v902_v25 }
 0x21f   : > { %v2642_v39 = vadd.f32 %v2630_v35, %v1359_v17  ;;  %1289 = vmatmul.bf16.gmra.mxu2 %v1006_v10  ;;  %v1173_v8 = vpop.f32.mrf.mxu1  ;;  %v1008_v60 = vpack.c.bf16 %v966_v7, %v964_v41 }
 0x222   : > { %v1250_v26 = vpop.f32.mrf.mxu2  ;;  %v1305_v9 = vpop.f32.mrf.mxu3 }
 0x223   : > { %v1251_v27 = vadd.f32 %v1250_v26, %v1161_v42  ;;  %v1306_v10 = vadd.f32 %v1305_v9, %v2609_v22  ;;  %v904_v26 = vunpack.c.2.s8 %v854_v18 }
 0x225   : > { %v1360_v38 = vmul.f32 %v1251_v27, %v2387_v53  ;;  %v1382_v53 = vmul.f32 %v1306_v10, %v2375_v48  ;;  %v906_v27 = vunpack.c.3.s8 %v854_v18  ;;  %v968_v22 = vcvt.s32.f32 %v904_v26 }
 0x227   : > { %v2651_v40 = vadd.f32 %v2630_v35, %v1360_v38  ;;  %v2660_v32 = vadd.f32 %v2630_v35, %v1382_v53  ;;  %v1176_v25 = vpop.f32.mrf.mxu1  ;;  %v970_v48 = vcvt.s32.f32 %v906_v27 }
 0x22a   : > { %v1252_v57 = vpop.f32.mrf.mxu2 }
 0x22b   : > { %v1253_v21 = vadd.f32 %v1252_v57, %v1163_v1  ;;  %v1307_v1 = vpop.f32.mrf.mxu3 }
 0x22c   : > { %v1308_v38 = vadd.f32 %v1307_v1, %v2611_v56 }
 0x22d   : > { %v1361_v44 = vmul.f32 %v1253_v21, %v2392_v54  ;;  %v1010_v21 = vpack.c.bf16 %v970_v48, %v968_v22 }
 0x22e   : > { %v1383_v41 = vmul.f32 %v1308_v38, %v2381_v50 }
 0x22f   : > { %v2655_v42 = vadd.f32 %v2630_v35, %v1361_v44  ;;  %1294 = vmatmul.bf16.gmra.mxu2 %v1008_v60  ;;  %v1178_v44 = vpop.f32.mrf.mxu1 }
 0x232   : > { %v1255_v62 = vpop.f32.mrf.mxu2 }
 0x233   : > { %v1256_v17 = vadd.f32 %v1255_v62, %v1166_v24  ;;  %v2669_v24 = vadd.f32 %v2630_v35, %v1383_v41  ;;  %v1310_v60 = vpop.f32.mrf.mxu3 }
 0x234   : > { %v1311_v50 = vadd.f32 %v1310_v60, %v2613_v47 }
 0x235   : > { %v1362_v54 = vmul.f32 %v1256_v17, %v2412_v4 }
 0x236   : > { %v1384_v4 = vmul.f32 %v1311_v50, %v2400_v63 }
 0x237   : > { %v2666_v7 = vadd.f32 %v2630_v35, %v1362_v54  ;;  %v1181_v1 = vpop.f32.mrf.mxu1 }
 0x238   : > { %v2678_v62 = vadd.f32 %v2630_v35, %v1384_v4 }
 0x23a   : > { %v1257_v18 = vpop.f32.mrf.mxu2 }
 0x23b   : > { %v1258_v57 = vadd.f32 %v1257_v18, %v1168_v61  ;;  %v1312_v17 = vpop.f32.mrf.mxu3 }
 0x23c   : > { %v1313_v61 = vadd.f32 %v1312_v17, %v2618_v2 }
 0x23d   : > { %v1363_v9 = vmul.f32 %v1258_v57, %v2417_v5 }
 0x23e   : > { %v1385_v5 = vmul.f32 %v1313_v61, %v2405_v0 }
 0x23f   : > { %v2673_v56 = vadd.f32 %v2630_v35, %v1363_v9  ;;  %1299 = vmatmul.bf16.gmra.mxu2 %v1010_v21  ;;  %v1183_v22 = vpop.f32.mrf.mxu1 }
 0x240   : > { %v2687_v47 = vadd.f32 %v2630_v35, %v1385_v5 }
 0x242   : > { %v1260_v10 = vpop.f32.mrf.mxu2 }
 0x243   : > { %v1261_v53 = vadd.f32 %v1260_v10, %v1171_v55  ;;  %v1315_v55 = vpop.f32.mrf.mxu3 }
 0x244   : > { %v1316_v2 = vadd.f32 %v1315_v55, %v2623_v12 }
 0x245   : > { %v1364_v26 = vmul.f32 %v1261_v53, %v2437_v19 }
 0x246   : > { %v1386_v19 = vmul.f32 %v1316_v2, %v2425_v14 }
 0x247   : > { %v2684_v27 = vadd.f32 %v2630_v35, %v1364_v26 }
 0x248   : > { %v2696_v18 = vadd.f32 %v2630_v35, %v1386_v19 }
 0x24a   : > { %v1262_v63 = vpop.f32.mrf.mxu2 }
 0x24b   : > { %v1263_v38 = vadd.f32 %v1262_v63, %v1173_v8  ;;  %v1317_v57 = vpop.f32.mrf.mxu3 }
 0x24c   : > { %v1318_v21 = vadd.f32 %v1317_v57, %v2632_v37 }
 0x24d   : > { %v1365_v54 = vmul.f32 %v1263_v38, %v2442_v20 }
 0x24e   : > { %v1387_v20 = vmul.f32 %v1318_v21, %v2430_v15 }
 0x24f   : > { %v2691_v41 = vadd.f32 %v2630_v35, %v1365_v54 }
 0x250   : > { %v2705_v12 = vadd.f32 %v2630_v35, %v1387_v20 }
 0x252   : > { %v1265_v0 = vpop.f32.mrf.mxu2 }
 0x253   : > { %v1266_v48 = vadd.f32 %v1265_v0, %v1176_v25  ;;  %v1320_v50 = vpop.f32.mrf.mxu3  ;;  %v1186_v25 = vpop.f32.mrf.mxu1 }
 0x254   : > { %v1321_v37 = vadd.f32 %v1320_v50, %v2638_v11 }
 0x255   : > { %v1366_v8 = vmul.f32 %v1266_v48, %v2461_v33 }
 0x256   : > { %v1388_v33 = vmul.f32 %v1321_v37, %v2449_v28 }
 0x257   : > { %v2702_v60 = vadd.f32 %v2630_v35, %v1366_v8 }
 0x258   : > { %v2714_v17 = vadd.f32 %v2630_v35, %v1388_v33 }
 0x25a   : > { %v1267_v14 = vpop.f32.mrf.mxu2 }
 0x25b   : > { %v1268_v9 = vadd.f32 %v1267_v14, %v1178_v44  ;;  %v1322_v61 = vpop.f32.mrf.mxu3  ;;  %v1188_v5 = vpop.f32.mrf.mxu1 }
 0x25c   : > { %v1323_v26 = vadd.f32 %v1322_v61, %v2647_v36 }
 0x25d   : > { %v1367_v4 = vmul.f32 %v1268_v9, %v2466_v34 }
 0x25e   : > { %v1389_v34 = vmul.f32 %v1323_v26, %v2454_v29 }
 0x25f   : > { %v2709_v10 = vadd.f32 %v2630_v35, %v1367_v4 }
 0x260   : > { %v2723_v11 = vadd.f32 %v2630_v35, %v1389_v34 }
 0x262   : > { %v1270_v15 = vpop.f32.mrf.mxu2 }
 0x263   : > { %v1271_v53 = vadd.f32 %v1270_v15, %v1181_v1  ;;  %v1191_v54 = vpop.f32.mrf.mxu1 }
 0x265   : > { %v1368_v44 = vmul.f32 %v1271_v53, %v2478_v45 }
 0x267   : > { %v2720_v63 = vadd.f32 %v2630_v35, %v1368_v44 }
 0x26a   : > { %v1272_v28 = vpop.f32.mrf.mxu2 }
 0x26b   : > { %v1273_v38 = vadd.f32 %v1272_v28, %v1183_v22  ;;  %v1193_v0 = vpop.f32.mrf.mxu1 }
 0x26d   : > { %v1369_v1 = vmul.f32 %v1273_v38, %v2483_v46 }
 0x26f   : > { %v2727_v55 = vadd.f32 %v2630_v35, %v1369_v1 }
 0x272   : > { %v1275_v36 = vpop.f32.mrf.mxu2 }
 0x273   : > { %v1276_v2 = vadd.f32 %v1275_v36, %v1186_v25  ;;  %v1196_v8 = vpop.f32.mrf.mxu1 }
 0x275   : > { %v1370_v45 = vmul.f32 %v1276_v2, %v2497_v58 }
 0x277   : > { %v2731_v29 = vadd.f32 %v2630_v35, %v1370_v45 }
 0x27a   : > { %v1277_v19 = vpop.f32.mrf.mxu2 }
 0x27b   : > { %v1278_v48 = vadd.f32 %v1277_v19, %v1188_v5  ;;  %v1198_v25 = vpop.f32.mrf.mxu1 }
 0x27d   : > { %v1371_v57 = vmul.f32 %v1278_v48, %v2502_v59 }
 0x27f   : > { %v2735_v22 = vadd.f32 %v2630_v35, %v1371_v57 }
 0x282   : > { %v1280_v46 = vpop.f32.mrf.mxu2 }
 0x283   : > { %v1281_v21 = vadd.f32 %v1280_v46, %v1191_v54  ;;  %v1201_v53 = vpop.f32.mrf.mxu1 }
 0x285   : > { %v1372_v20 = vmul.f32 %v1281_v21, %v2509_v3 }
 0x287   : > { %v2739_v14 = vadd.f32 %v2630_v35, %v1372_v20 }
 0x28a   : > { %v1282_v58 = vpop.f32.mrf.mxu2 }
 0x28b   : > { %v1283_v9 = vadd.f32 %v1282_v58, %v1193_v0 }
 0x28d   : > { %v1373_v50 = vmul.f32 %v1283_v9, %v2514_v6  ;;  %v1203_v6 = vpop.f32.mrf.mxu1 }
 0x28f   : > { %v2743_v4 = vadd.f32 %v2630_v35, %v1373_v50 }
 0x292   : > { %v1285_v59 = vpop.f32.mrf.mxu2 }
 0x293   : > { %v1286_v37 = vadd.f32 %v1285_v59, %v1196_v8 }
 0x295   : > { %v1374_v33 = vmul.f32 %v1286_v37, %v2521_v13  ;;  %v1206_v54 = vpop.f32.mrf.mxu1 }
 0x297   : > { %v2747_v15 = vadd.f32 %v2630_v35, %v1374_v33 }
 0x29a   : > { %v1287_v3 = vpop.f32.mrf.mxu2 }
 0x29b   : > { %v1288_v61 = vadd.f32 %v1287_v3, %v1198_v25 }
 0x29d   : > { %v1375_v26 = vmul.f32 %v1288_v61, %v2526_v16  ;;  %v1208_v0 = vpop.f32.mrf.mxu1 }
 0x29f   : > { %v2751_v44 = vadd.f32 %v2630_v35, %v1375_v26 }
 0x2a2   : > { %v1290_v5 = vpop.f32.mrf.mxu2 }
 0x2a3   : > { %v1291_v34 = vadd.f32 %v1290_v5, %v1201_v53 }
 0x2a5   : > { %v1376_v28 = vmul.f32 %v1291_v34, %v2533_v30  ;;  %v1211_v8 = vpop.f32.mrf.mxu1 }
 0x2a7   : > { %v2755_v38 = vadd.f32 %v2630_v35, %v1376_v28 }
 0x2aa   : > { %v1292_v13 = vpop.f32.mrf.mxu2 }
 0x2ab   : > { %v1293_v1 = vadd.f32 %v1292_v13, %v1203_v6 }
 0x2ad   : > { %v1377_v36 = vmul.f32 %v1293_v1, %v2538_v31 }
 0x2af   : > { %v2759_v2 = vadd.f32 %v2630_v35, %v1377_v36 }
 0x2b2   : > { %v1295_v16 = vpop.f32.mrf.mxu2 }
 0x2b3   : > { %v1296_v45 = vadd.f32 %v1295_v16, %v1206_v54 }
 0x2b5   : > { %v1378_v19 = vmul.f32 %v1296_v45, %v2546_v51  ;;  %v1213_v51 = vpop.f32.mrf.mxu1 }
 0x2b7   : > { %v2763_v48 = vadd.f32 %v2630_v35, %v1378_v19 }
 0x2ba   : > { %v1297_v30 = vpop.f32.mrf.mxu2 }
 0x2bb   : > { %v1298_v57 = vadd.f32 %v1297_v30, %v1208_v0 }
 0x2bd   : > { %v1379_v46 = vmul.f32 %v1298_v57, %v2551_v52 }
 0x2bf   : > { %v2767_v21 = vadd.f32 %v2630_v35, %v1379_v46 }
 0x2c2   : > { %v1300_v31 = vpop.f32.mrf.mxu2 }
 0x2c3   : > { %v1301_v20 = vadd.f32 %v1300_v31, %v1211_v8 }
 0x2c5   : > { %v1380_v58 = vmul.f32 %v1301_v20, %v2567_v49 }
 0x2c7   : > { %v2771_v9 = vadd.f32 %v2630_v35, %v1380_v58 }
 0x2ca   : > { %v1302_v50 = vpop.f32.mrf.mxu2 }
 0x2cb   : > { %v1303_v25 = vadd.f32 %v1302_v50, %v1213_v51  ;;  %1429 = sbr.rel (%p1884_p8) target bundleno = 742 (0x2e6), region = 64 }
 0x2cd   : > { %v1381_v59 = vmul.f32 %v1303_v25, %v2572_v23 }
 0x2cf   : > { %v2775_v37 = vadd.f32 %v2630_v35, %v1381_v59 }
 0x2d0   : > { %v1430_v52 = vmax.f32 %v2636_v43, 0.0  ;;  %v1431_v49 = vmax.f32 %v2642_v39, 0.0  ;;  %s2952_s14 = smov (!%p1495_p9, %s1499_s14), %s1498_s12  ;;  %v1432_v23 = vmax.f32 %v2651_v40, 0.0  ;;  %v1433_v35 = vmax.f32 %v2655_v42, 0.0 }
 0x2d1   : > { %p1887_p10 = scmp.lt.s32.totalorder %s2952_s14, 0  ;;  %s1505_s15 = sadd.s32 2, %s2952_s14  ;;  %v1434_v33 = vmax.f32 %v2666_v7, 0.0  ;;  %v1435_v53 = vmax.f32 %v2673_v56, 0.0  ;;  %v1436_v3 = vmax.f32 %v2684_v27, 0.0  ;;  %v1437_v61 = vmax.f32 %v2691_v41, 0.0 }
 0x2d2   : > { %v2022_v26 = vpack.c.bf16 %v1431_v49, %v1430_v52  ;;  %v1438_v6 = vmax.f32 %v2702_v60, 0.0  ;;  %v1439_v5 = vmax.f32 %v2709_v10, 0.0  ;;  %v2027_v34 = vpack.c.bf16 %v1433_v35, %v1432_v23 }
 0x2d3   : > { %s2954_s15 = smov (!%p1887_p10, %s1505_s15), %s2952_s14  ;;  %v1440_v28 = vmax.f32 %v2720_v63, 0.0  ;;  %v1441_v13 = vmax.f32 %v2727_v55, 0.0  ;;  %v2032_v1 = vpack.c.bf16 %v1435_v53, %v1434_v33  ;;  %v1442_v54 = vmax.f32 %v2731_v29, 0.0 }
 0x2d4   : > { %s1937_s17 = sshll.u32 %s2954_s15, 7  ;;  %v1443_v36 = vmax.f32 %v2735_v22, 0.0  ;;  %v2037_v16 = vpack.c.bf16 %v1437_v61, %v1436_v3  ;;  %v1444_v45 = vmax.f32 %v2739_v14, 0.0  ;;  %v1445_v19 = vmax.f32 %v2743_v4, 0.0 }
 0x2d5   : > { %s2795_s18 = scalar_lea.vmem [#allocation2], %s1937_s17  ;;  %v2042_v0 = vpack.c.bf16 %v1439_v5, %v1438_v6  ;;  %v1446_v30 = vmax.f32 %v2747_v15, 0.0  ;;  %v1447_v57 = vmax.f32 %v2751_v44, 0.0  ;;  %v2047_v46 = vpack.c.bf16 %v1441_v13, %v1440_v28 }
 0x2d6   : > { %2023 = vst [vmem:[%s2795_s18] sm:$0xff] %v2022_v26   ;;  %v1448_v8 = vmax.f32 %v2755_v38, 0.0  ;;  %v1449_v31 = vmax.f32 %v2759_v2, 0.0  ;;  %v2052_v20 = vpack.c.bf16 %v1443_v36, %v1442_v54  ;;  %v1450_v58 = vmax.f32 %v2763_v48, 0.0 }
 0x2d7   : > { %2114 = vst [vmem:[%s2795_s18 + $0x8] sm:$0xff] %v2027_v34   ;;  %v1451_v51 = vmax.f32 %v2767_v21, 0.0  ;;  %v2057_v50 = vpack.c.bf16 %v1445_v19, %v1444_v45  ;;  %v1452_v25 = vmax.f32 %v2771_v9, 0.0  ;;  %v1453_v59 = vmax.f32 %v2775_v37, 0.0 }
 0x2d8   : > { %2115 = vst [vmem:[%s2795_s18 + $0x10] sm:$0xff] %v2032_v1   ;;  %v2062_v52 = vpack.c.bf16 %v1447_v57, %v1446_v30  ;;  %v1454_v49 = vmax.f32 %v2660_v32, 0.0  ;;  %v1455_v23 = vmax.f32 %v2669_v24, 0.0  ;;  %v2067_v35 = vpack.c.bf16 %v1449_v31, %v1448_v8 }
 0x2d9   : > { %2116 = vst [vmem:[%s2795_s18 + $0x18] sm:$0xff] %v2037_v16   ;;  %v1456_v33 = vmax.f32 %v2678_v62, 0.0  ;;  %v1457_v53 = vmax.f32 %v2687_v47, 0.0  ;;  %v2072_v3 = vpack.c.bf16 %v1451_v51, %v1450_v58  ;;  %v1458_v61 = vmax.f32 %v2696_v18, 0.0 }
 0x2da   : > { %2117 = vst [vmem:[%s2795_s18 + $0x20] sm:$0xff] %v2042_v0   ;;  %v1459_v26 = vmax.f32 %v2705_v12, 0.0  ;;  %v2077_v6 = vpack.c.bf16 %v1453_v59, %v1452_v25  ;;  %v1460_v5 = vmax.f32 %v2714_v17, 0.0  ;;  %v1461_v34 = vmax.f32 %v2723_v11, 0.0 }
 0x2db   : > { %2118 = vst [vmem:[%s2795_s18 + $0x28] sm:$0xff] %v2047_v46   ;;  %v2082_v28 = vpack.c.bf16 %v1455_v23, %v1454_v49  ;;  %v2087_v13 = vpack.c.bf16 %v1457_v53, %v1456_v33 }
 0x2dc   : > { %2119 = vst [vmem:[%s2795_s18 + $0x30] sm:$0xff] %v2052_v20   ;;  %v2092_v1 = vpack.c.bf16 %v1459_v26, %v1458_v61  ;;  %v2097_v54 = vpack.c.bf16 %v1461_v34, %v1460_v5 }
 0x2dd   : > { %2120 = vst [vmem:[%s2795_s18 + $0x38] sm:$0xff] %v2057_v50  }
 0x2de   : > { %2121 = vst [vmem:[%s2795_s18 + $0x40] sm:$0xff] %v2062_v52  }
 0x2df   : > { %2122 = vst [vmem:[%s2795_s18 + $0x48] sm:$0xff] %v2067_v35  }
 0x2e0   : > { %2123 = vst [vmem:[%s2795_s18 + $0x50] sm:$0xff] %v2072_v3  }
 0x2e1   : > { %2124 = vst [vmem:[%s2795_s18 + $0x58] sm:$0xff] %v2077_v6  }
 0x2e2   : > { %2125 = vst [vmem:[%s2795_s18 + $0x60] sm:$0xff] %v2082_v28  }
 0x2e3   : > { %2126 = vst [vmem:[%s2795_s18 + $0x68] sm:$0xff] %v2087_v13  }
 0x2e4   : > { %2127 = vst [vmem:[%s2795_s18 + $0x70] sm:$0xff] %v2092_v1  }
 0x2e5   : > { %2128 = vst [vmem:[%s2795_s18 + $0x78] sm:$0xff] %v2097_v54  }
 0x2e6 PF: > { %p1545_p11 = scmp.eq.s32.totalorder %s2194_s27, 2  ;;  %p1890_p12 = scmp.ne.s32.totalorder %s2194_s27, 2 }
 0x2e8   : > { %1548 = sbr.rel (%p1890_p12) target bundleno = 911 (0x38f), region = 68 }
 0x2ed   : > { %1552 = vmatpush.msra.mxu0 %v2743_v4  ;;  %1572 = vmatpush.msra.mxu1 %v2723_v11 }
 0x2ef   : > { %1553 = vmatpush.msra.mxu0 %v2739_v14  ;;  %1573 = vmatpush.msra.mxu1 %v2714_v17 }
 0x2f1   : > { %1554 = vmatpush.msra.mxu0 %v2735_v22  ;;  %1574 = vmatpush.msra.mxu1 %v2705_v12 }
 0x2f3   : > { %1555 = vmatpush.msra.mxu0 %v2731_v29  ;;  %1575 = vmatpush.msra.mxu1 %v2696_v18 }
 0x2f5   : > { %1556 = vmatpush.msra.mxu0 %v2727_v55  ;;  %1576 = vmatpush.msra.mxu1 %v2687_v47 }
 0x2f7   : > { %1557 = vmatpush.msra.mxu0 %v2720_v63  ;;  %1577 = vmatpush.msra.mxu1 %v2678_v62 }
 0x2f9   : > { %1558 = vmatpush.msra.mxu0 %v2709_v10  ;;  %1578 = vmatpush.msra.mxu1 %v2669_v24 }
 0x2fb   : > { %1559 = vmatpush.msra.mxu0 %v2702_v60  ;;  %1579 = vmatpush.msra.mxu1 %v2660_v32  ;;  %v1550_v32 = vld [vmem:[%s2939_s5] sm:$0xff] }
 0x2fd   : > { %1560 = vmatpush.msra.mxu0 %v2691_v41  ;;  %1580 = vmatpush.msra.mxu1 %v2775_v37 }
 0x2ff   : > { %1561 = vmatpush.msra.mxu0 %v2684_v27  ;;  %1581 = vmatpush.msra.mxu1 %v2771_v9 }
 0x301   : > { %1562 = vmatpush.msra.mxu0 %v2673_v56  ;;  %1582 = vmatpush.msra.mxu1 %v2767_v21 }
 0x303   : > { %1563 = vmatpush.msra.mxu0 %v2666_v7  ;;  %1583 = vmatpush.msra.mxu1 %v2763_v48  ;;  %v1551_v7 = vld [vmem:[%s2939_s5 + $0x8] sm:$0xff] }
 0x305   : > { %1564 = vmatpush.msra.mxu0 %v2655_v42  ;;  %1584 = vmatpush.msra.mxu1 %v2759_v2  ;;  %v1549_v42 = vld [vmem:[#allocation4] sm:$0xff] }
 0x307   : > { %1565 = vmatpush.msra.mxu0 %v2651_v40  ;;  %1585 = vmatpush.msra.mxu1 %v2755_v38 }
 0x309   : > { %1566 = vmatpush.msra.mxu0 %v2642_v39  ;;  %1586 = vmatpush.msra.mxu1 %v2751_v44 }
 0x30b   : > { %1567 = vmatpush.msra.mxu0 %v2636_v43  ;;  %1587 = vmatpush.msra.mxu1 %v2747_v15 }
 0x30c   : > { %1568 = vmatmul.f32.vlgmr.msra.gmra.mxu0 %v1550_v32  ;;  %1588 = vmatmul.f32.vlgmr.msra.gmra.mxu1 %v1551_v7 }
 0x389   : > { %v1569_v40 = vpop.f32.mrf.mxu0  ;;  %v1589_v24 = vpop.f32.mrf.mxu1 }
 0x38a   : > { %v1590_v39 = vadd.f32 %v1589_v24, %v1569_v40 }
 0x38c   : > { %v1592_v56 = vadd.f32 %v1590_v39, %v1549_v42 }
 0x38e   : > { %1593 = vst [vmem:[#allocation4] sm:$0xff] %v1592_v56 }
 0x38f PF: > { %1597 = sbr.rel (!%p1545_p11) target bundleno = 1072 (0x430), region = 72  ;;  %v1614_v62 = vld [vmem:[%s2940_s6 + $0x78] sm:$0xff] (%p1545_p11)  ;;  %v1613_v43 = vld [vmem:[%s2940_s6 + $0x70] sm:$0xff] (%p1545_p11)  ;;  %v1612_v27 = vld [vmem:[%s2940_s6 + $0x68] sm:$0xff] (%p1545_p11) }
 0x390   : > { %1619 = vmatpush.msra.mxu0 (%p1545_p11), %v1614_v62  ;;  %v1611_v47 = vld [vmem:[%s2940_s6 + $0x60] sm:$0xff] (%p1545_p11)  ;;  %v1610_v41 = vld [vmem:[%s2940_s6 + $0x58] sm:$0xff] (%p1545_p11)  ;;  %v1609_v18 = vld [vmem:[%s2940_s6 + $0x50] sm:$0xff] (%p1545_p11) }
 0x391   : > { %v1608_v60 = vld [vmem:[%s2940_s6 + $0x48] sm:$0xff] (%p1545_p11)  ;;  %v1607_v12 = vld [vmem:[%s2940_s6 + $0x40] sm:$0xff] (%p1545_p11)  ;;  %v1606_v10 = vld [vmem:[%s2940_s6 + $0x38] sm:$0xff] (%p1545_p11) }
 0x392   : > { %1620 = vmatpush.msra.mxu0 (%p1545_p11), %v1613_v43  ;;  %v1605_v17 = vld [vmem:[%s2940_s6 + $0x30] sm:$0xff] (%p1545_p11)  ;;  %v1604_v63 = vld [vmem:[%s2940_s6 + $0x28] sm:$0xff] (%p1545_p11)  ;;  %v1603_v11 = vld [vmem:[%s2940_s6 + $0x20] sm:$0xff] (%p1545_p11) }
 0x393   : > { %v1602_v55 = vld [vmem:[%s2940_s6 + $0x18] sm:$0xff] (%p1545_p11)  ;;  %v1601_v29 = vld [vmem:[%s2940_s6 + $0x10] sm:$0xff] (%p1545_p11)  ;;  %v1600_v22 = vld [vmem:[%s2940_s6 + $0x8] sm:$0xff] (%p1545_p11) }
 0x394   : > { %1621 = vmatpush.msra.mxu0 %v1612_v27  ;;  %v1599_v14 = vld [vmem:[%s2940_s6] sm:$0xff] }
 0x395   : > { %v1598_v4 = vld [vmem:[#allocation4] sm:$0xff] }
 0x396   : > { %1622 = vmatpush.msra.mxu0 %v1611_v47  ;;  %v2179_v15 = vld [vmem:[%s2941_s7] ss:$0 sm:$0xff] }
 0x398   : > { %1623 = vmatpush.msra.mxu0 %v1610_v41 }
 0x39a   : > { %1624 = vmatpush.msra.mxu0 %v1609_v18 }
 0x39c   : > { %1625 = vmatpush.msra.mxu0 %v1608_v60 }
 0x39e   : > { %1626 = vmatpush.msra.mxu0 %v1607_v12 }
 0x3a0   : > { %1627 = vmatpush.msra.mxu0 %v1606_v10 }
 0x3a2   : > { %1628 = vmatpush.msra.mxu0 %v1605_v17 }
 0x3a4   : > { %1629 = vmatpush.msra.mxu0 %v1604_v63 }
 0x3a6   : > { %1630 = vmatpush.msra.mxu0 %v1603_v11 }
 0x3a8   : > { %1631 = vmatpush.msra.mxu0 %v1602_v55 }
 0x3aa   : > { %1632 = vmatpush.msra.mxu0 %v1601_v29 }
 0x3ac   : > { %1633 = vmatpush.msra.mxu0 %v1600_v22 }
 0x3ae   : > { %1634 = vmatpush.msra.mxu0 %v1599_v14 }
 0x3af   : > { %1635 = vmatmul.f32.vlgmr.msra.gmra.mxu0 %v1598_v4 }
 0x42c   : > { %v1636_v44 = vpop.f32.mrf.mxu0 }
 0x42d   : > { %v1637_v38 = vadd.f32 %v2179_v15, %v1636_v44 }
 0x42f   : > { %1639 = vst [vmem:[%s2942_s8] sm:$0xff] %v1637_v38 }
 0x430 PF: > { %s18_s29 = sadd.s32 1, %s2202_s29   ;;  %s2943_s27 = smov %s2198_s28 }
 0x431   : > { %p15_p13 = scmp.ge.s32.totalorder %s18_s29, 5   ;;  %s2944_s28 = smov %s2946_s30 }
 0x433   :  { %17 = sbr.rel (!%p15_p13) target bundleno = 2 (0x2), region = 108 }

</bundles_post_ra>
